<compile_context>
chip_gen: v6e
topology: v6e:2x2x1
jax: 0.10.0
libtpu: 0.0.40
codegen_flags: <defaults>
</compile_context>

<pallas_src>
import jax
import jax.numpy as jnp
from jax import lax
from jax.experimental import pallas as pl
from jax.experimental.pallas import tpu as pltpu

KGE_SIZE = 160
NOISE_SIZE = KGE_SIZE
IN_FEATURES = NOISE_SIZE + KGE_SIZE  # 320
PATTERN_NUM = 32
PATTERN_LEN = 24
LN_EPS = 1e-5

_MAX_TB = 8192           # double-buffered x+out ~22.5 MB -> safe on all chips


def _erf_f32(x):
    # Eigen/XLA f32 rational polynomial approximation of erf (matches erf to
    # f32 precision); mul/add (+ one EUP reciprocal) only -> always lowers.
    alpha = (
        -2.72614225801306e-10, 2.77068142495902e-08, -2.10102402082508e-06,
        -5.69250639462346e-05, -7.34990630326855e-04, -2.95459980854025e-03,
        -1.60960333262415e-02,
    )
    beta = (
        -1.45660718464996e-05, -2.13374055278905e-04, -1.68282697438203e-03,
        -7.37332916720468e-03, -1.42647390514189e-02,
    )
    x = jnp.clip(x, -4.0, 4.0)
    x2 = x * x
    num = jnp.full_like(x2, alpha[0])
    for c in alpha[1:]:
        num = num * x2 + c
    den = jnp.full_like(x2, beta[0])
    for c in beta[1:]:
        den = den * x2 + c
    # den is bounded away from 0 on the clipped range; exact reciprocal keeps
    # GELU accuracy unchanged while moving the divide off the VALU path.
    return x * num * pl.reciprocal(den)


def _gelu_exact(x):
    inv_sqrt2 = 0.7071067811865476
    return 0.5 * x * (1.0 + _erf_f32(x * inv_sqrt2))


def _layernorm_cols(y, gamma, beta):
    # LayerNorm over the feature axis == axis 0 of the transposed [F, TB] slab.
    # gamma/beta arrive as [F, 1] columns (lane-broadcast).
    # NOTE: zero-padded batch columns stay finite only because of LN_EPS in the
    # rsqrt (0 * large * gamma + beta); keep eps > 0.
    mean = jnp.mean(y, axis=0, keepdims=True)
    var = jnp.mean((y - mean) ** 2, axis=0, keepdims=True)
    return (y - mean) * lax.rsqrt(var + LN_EPS) * gamma + beta


def generator_kernel(x_ref, w_ref, b_ref, g1_ref, be1_ref,
                     pat_t_ref, g2_ref, be2_ref, o_ref):
    x = x_ref[...]          # [TB, IN]   (batch-major tile straight from HBM)
    w = w_ref[...]          # [P, IN]    (original PyTorch weight layout)

    # y^T = W @ x^T  -> [P, TB]   (rhs contracted on its last dim).  HIGHEST
    # precision is free here: the kernel is HBM-bound and the MXU is idle.
    yT = lax.dot_general(
        w, x, dimension_numbers=(((1,), (1,)), ((), ())),
        preferred_element_type=jnp.float32,
        precision=lax.Precision.HIGHEST,
    ) + b_ref[...]                                           # [P, TB]

    # LayerNorm(pattern_num) over the feature (sublane) axis.
    yT = _layernorm_cols(yT, g1_ref[...], be1_ref[...])

    # Softmax over the pattern axis (feature dim of each batch column).
    # approx reciprocal: the per-column scale error cancels in LayerNorm2.
    yT = yT - jnp.max(yT, axis=0, keepdims=True)
    e = jnp.exp(yT)
    pT = e * pl.reciprocal(jnp.sum(e, axis=0, keepdims=True), approx=True)

    # h^T = patterns^T @ p^T : [L, P] @ [P, TB] -> [L, TB]
    hT = jnp.dot(pat_t_ref[...], pT, preferred_element_type=jnp.float32,
                 precision=lax.Precision.HIGHEST)

    # LayerNorm(pattern_length) over the feature (sublane) axis.
    hT = _layernorm_cols(hT, g2_ref[...], be2_ref[...])

    # Exact (erf) GELU; [L, TB] output block -> unmasked lane-dense stores.
    o_ref[...] = _gelu_exact(hT).astype(o_ref.dtype)


def _round_up(v, m):
    return ((v + m - 1) // m) * m


def _pick_tiling(B, block_b):
    """Choose (TB, nb, Bp): batch tile, grid steps, padded batch."""
    block_b = min(block_b, _MAX_TB)
    # Tiny batches: one full-extent block (masked stores; perf-irrelevant).
    if B <= 256:
        return B, 1, B
    # Ensure >=2 grid steps so the "parallel" batch axis can shard across both
    # v7x TensorCores, and aim for an even, balanced step count.
    nb_target = max(2, pl.cdiv(B, block_b))
    if nb_target % 2:
        nb_target += 1
    TB = _round_up(pl.cdiv(B, nb_target), 128)
    nb = pl.cdiv(B, TB)
    return TB, nb, nb * TB


def generator_p_hd_sum(x, w, b, gamma1, beta1, patterns, gamma2, beta2,
                       *, block_b=4096, feature_major_out=False):
    """Forward pass of GeneratorP_HD_SUM.

    x: [B, 320] f32 -> [B, 24] f32 (or [24, B] if feature_major_out=True,
    which skips the wrapper-side transpose / extra HBM pass entirely).
    """
    B = x.shape[0]
    TB, nb, Bp = _pick_tiling(B, block_b)
    if Bp != B:
        # Zero-pad the tail block: all math is per-batch-column, padded
        # columns stay finite (LN of a constant column is 0*gamma+beta via the
        # eps) and are sliced away below.
        x = jnp.pad(x, ((0, Bp - B), (0, 0)))

    # Parameters reshaped for the transposed (feature-major) pipeline.
    b_c = b.reshape(PATTERN_NUM, 1)
    g1_c = gamma1.reshape(PATTERN_NUM, 1)
    be1_c = beta1.reshape(PATTERN_NUM, 1)
    pat_t = jnp.transpose(patterns)               # [L, P] = [24, 32]
    g2_c = gamma2.reshape(PATTERN_LEN, 1)
    be2_c = beta2.reshape(PATTERN_LEN, 1)

    const = lambda shape: pl.BlockSpec(shape, lambda i: (0, 0))

    # Scoped-VMEM budget sized from the actual tiles (double-buffered x + out)
    # plus headroom; overrides v5e's 16 MiB default, stays far under v7x's
    # 64 MiB physical VMEM for any allowed TB.
    tile_bytes = 4 * TB * (IN_FEATURES + PATTERN_LEN)
    vmem_limit = int(min(2 * tile_bytes + (8 << 20), 56 << 20))

    param_bytes = 4 * (PATTERN_NUM * IN_FEATURES + 3 * PATTERN_NUM
                       + PATTERN_NUM * PATTERN_LEN + 2 * PATTERN_LEN)
    cost = pl.CostEstimate(
        flops=int(2 * Bp * IN_FEATURES * PATTERN_NUM
                  + 2 * Bp * PATTERN_NUM * PATTERN_LEN),
        transcendentals=int(Bp * PATTERN_NUM),
        bytes_accessed=int(Bp * IN_FEATURES * 4 + Bp * PATTERN_LEN * 4
                           + param_bytes),
    )

    out_t = pl.pallas_call(
        generator_kernel,
        out_shape=jax.ShapeDtypeStruct((PATTERN_LEN, Bp), jnp.float32),
        grid=(nb,),
        in_specs=[
            pl.BlockSpec((TB, IN_FEATURES), lambda i: (i, 0)),   # x (tiled)
            const((PATTERN_NUM, IN_FEATURES)),                   # linear weight
            const((PATTERN_NUM, 1)),                             # linear bias
            const((PATTERN_NUM, 1)),                             # LN1 gamma
            const((PATTERN_NUM, 1)),                             # LN1 beta
            const((PATTERN_LEN, PATTERN_NUM)),                   # patterns^T
            const((PATTERN_LEN, 1)),                             # LN2 gamma
            const((PATTERN_LEN, 1)),                             # LN2 beta
        ],
        out_specs=pl.BlockSpec((PATTERN_LEN, TB), lambda i: (0, i)),
        compiler_params=pltpu.CompilerParams(
            dimension_semantics=("parallel",),
            vmem_limit_bytes=vmem_limit),
        cost_estimate=cost,
    )(x, w, b_c, g1_c, be1_c, pat_t, g2_c, be2_c)

    if feature_major_out:
        # Native kernel layout; zero-copy when Bp == B.
        return out_t[:, :B]
    # Module-native [B, 24]: tiny transpose in the wrapper (separate XLA pass;
    # prefer feature_major_out=True if the consumer can take [24, B]).
    return jnp.transpose(out_t)[:B]


def _reference(x, w, b, gamma1, beta1, patterns, gamma2, beta2):
    y = jnp.matmul(x, w.T, precision=lax.Precision.HIGHEST) + b
    m = y.mean(-1, keepdims=True)
    v = ((y - m) ** 2).mean(-1, keepdims=True)
    y = (y - m) / jnp.sqrt(v + LN_EPS) * gamma1 + beta1
    p = jax.nn.softmax(y, axis=-1)
    h = jnp.matmul(p, patterns, precision=lax.Precision.HIGHEST)
    m2 = h.mean(-1, keepdims=True)
    v2 = ((h - m2) ** 2).mean(-1, keepdims=True)
    h = (h - m2) / jnp.sqrt(v2 + LN_EPS) * gamma2 + beta2
    return jax.nn.gelu(h, approximate=False)


def _orthogonal(key, rows, cols):
    # Deterministic orthogonal init mirroring nn.init.orthogonal_ semantics.
    a = jax.random.normal(key, (max(rows, cols), min(rows, cols)), jnp.float32)
    q, r = jnp.linalg.qr(a)
    q = q * jnp.sign(jnp.diagonal(r))[None, :]
    return q.T if rows < cols else q[:rows, :cols]


if __name__ == "__main__":
    key = jax.random.PRNGKey(0)
    (k_x1, k_x2, k_w, k_b, k_p,
     k_g1, k_b1, k_g2, k_b2) = jax.random.split(key, 9)

    # Parameters (shapes match GeneratorP_HD_SUM.__init__; LN params random
    # to exercise the broadcasts, as trained values would be arbitrary).
    w = _orthogonal(k_w, PATTERN_NUM, IN_FEATURES)            # [32, 320]
    bound = IN_FEATURES ** -0.5
    b = jax.random.uniform(k_b, (PATTERN_NUM,), jnp.float32,
                           minval=-bound, maxval=bound)
    gamma1 = 1.0 + 0.1 * jax.random.normal(k_g1, (PATTERN_NUM,), jnp.float32)
    beta1 = 0.1 * jax.random.normal(k_b1, (PATTERN_NUM,), jnp.float32)
    patterns = _orthogonal(k_p, PATTERN_NUM, PATTERN_LEN)     # [32, 24]
    gamma2 = 1.0 + 0.1 * jax.random.normal(k_g2, (PATTERN_LEN,), jnp.float32)
    beta2 = 0.1 * jax.random.normal(k_b2, (PATTERN_LEN,), jnp.float32)

    # 1) Small batch -> single full-extent block path (nb=1).
    B1 = 4
    x1 = jax.random.normal(k_x1, (B1, IN_FEATURES), jnp.float32)
    out1 = jax.block_until_ready(
        generator_p_hd_sum(x1, w, b, gamma1, beta1, patterns, gamma2, beta2))
    ref1 = _reference(x1, w, b, gamma1, beta1, patterns, gamma2, beta2)
    assert out1.shape == (B1, PATTERN_LEN)
    assert jnp.allclose(out1, ref1, atol=1e-3, rtol=1e-3), \
        f"max abs err (B={B1}): {jnp.max(jnp.abs(out1 - ref1))}"

    # 2) Tiled batch with a padded tail block (nb=2, TB=256, Bp=512).
    B2 = 300
    x2 = jax.random.normal(k_x2, (B2, IN_FEATURES), jnp.float32)
    out2 = jax.block_until_ready(
        generator_p_hd_sum(x2, w, b, gamma1, beta1, patterns, gamma2, beta2))
    ref2 = _reference(x2, w, b, gamma1, beta1, patterns, gamma2, beta2)
    assert out2.shape == (B2, PATTERN_LEN)
    assert jnp.allclose(out2, ref2, atol=1e-3, rtol=1e-3), \
        f"max abs err (B={B2}): {jnp.max(jnp.abs(out2 - ref2))}"

    # 3) Feature-major output path (skips the wrapper transpose).
    out3 = jax.block_until_ready(
        generator_p_hd_sum(x2, w, b, gamma1, beta1, patterns, gamma2, beta2,
                           feature_major_out=True))
    assert out3.shape == (PATTERN_LEN, B2)
    assert jnp.allclose(out3, ref2.T, atol=1e-3, rtol=1e-3), \
        f"max abs err (feature-major): {jnp.max(jnp.abs(out3 - ref2.T))}"

    print("KERNEL_OK")
</pallas_src>

<mosaic_0001>
module attributes {stable_mosaic.version = 11 : i64} {
  func.func @generator_kernel(%arg0: i32, %arg1: memref<4x320xf32, #tpu.memory_space<vmem>>, %arg2: memref<32x320xf32, #tpu.memory_space<vmem>>, %arg3: memref<32x1xf32, #tpu.memory_space<vmem>>, %arg4: memref<32x1xf32, #tpu.memory_space<vmem>>, %arg5: memref<32x1xf32, #tpu.memory_space<vmem>>, %arg6: memref<24x32xf32, #tpu.memory_space<vmem>>, %arg7: memref<24x1xf32, #tpu.memory_space<vmem>>, %arg8: memref<24x1xf32, #tpu.memory_space<vmem>>, %arg9: memref<24x4xf32, #tpu.memory_space<vmem>>) attributes {dimension_semantics = [#tpu.dimension_semantics<parallel>], iteration_bounds = array<i64: 1>, scalar_prefetch = 0 : i64, scratch_operands = 0 : i64, tpu.core_type = #tpu.core_type<tc>, window_params = [{transform_indices = @transform_0, window_bounds = array<i64: 4, 320>}, {pipeline_mode = #tpu.pipeline_mode<synchronous>, transform_indices = @transform_1, window_bounds = array<i64: 32, 320>}, {pipeline_mode = #tpu.pipeline_mode<synchronous>, transform_indices = @transform_2, window_bounds = array<i64: 32, 1>}, {pipeline_mode = #tpu.pipeline_mode<synchronous>, transform_indices = @transform_3, window_bounds = array<i64: 32, 1>}, {pipeline_mode = #tpu.pipeline_mode<synchronous>, transform_indices = @transform_4, window_bounds = array<i64: 32, 1>}, {pipeline_mode = #tpu.pipeline_mode<synchronous>, transform_indices = @transform_5, window_bounds = array<i64: 24, 32>}, {pipeline_mode = #tpu.pipeline_mode<synchronous>, transform_indices = @transform_6, window_bounds = array<i64: 24, 1>}, {pipeline_mode = #tpu.pipeline_mode<synchronous>, transform_indices = @transform_7, window_bounds = array<i64: 24, 1>}, {transform_indices = @transform_8, window_bounds = array<i64: 24, 4>}]} {
    %c0 = arith.constant 0 : index
    %c0_0 = arith.constant 0 : index
    %0 = vector.load %arg1[%c0, %c0_0] : memref<4x320xf32, #tpu.memory_space<vmem>>, vector<4x320xf32>
    %c0_1 = arith.constant 0 : index
    %c0_2 = arith.constant 0 : index
    %1 = vector.load %arg2[%c0_1, %c0_2] : memref<32x320xf32, #tpu.memory_space<vmem>>, vector<32x320xf32>
    %cst = arith.constant dense<0.000000e+00> : vector<32x4xf32>
    %2 = tpu.matmul %1, %0, %cst {dimension_numbers = #tpu.dot_dimension_numbers<[1], [1], [0], [0], [0, 0, 1, 0], [], []>, precision = #tpu.contract_precision<fp32>} : vector<32x320xf32>, vector<4x320xf32>, vector<32x4xf32> -> vector<32x4xf32>
    %c0_3 = arith.constant 0 : index
    %c0_4 = arith.constant 0 : index
    %3 = vector.load %arg3[%c0_3, %c0_4] : memref<32x1xf32, #tpu.memory_space<vmem>>, vector<32x1xf32>
    %4 = vector.broadcast %3 : vector<32x1xf32> to vector<32x4xf32>
    %5 = arith.addf %2, %4 : vector<32x4xf32>
    %c0_5 = arith.constant 0 : index
    %c0_6 = arith.constant 0 : index
    %6 = vector.load %arg4[%c0_5, %c0_6] : memref<32x1xf32, #tpu.memory_space<vmem>>, vector<32x1xf32>
    %c0_7 = arith.constant 0 : index
    %c0_8 = arith.constant 0 : index
    %7 = vector.load %arg5[%c0_7, %c0_8] : memref<32x1xf32, #tpu.memory_space<vmem>>, vector<32x1xf32>
    %cst_9 = arith.constant dense<0.000000e+00> : vector<4xf32>
    %8 = vector.multi_reduction <add>, %5, %cst_9 [0] : vector<32x4xf32> to vector<4xf32>
    %9 = vector.shape_cast %8 : vector<4xf32> to vector<1x4xf32>
    %cst_10 = arith.constant 3.200000e+01 : f32
    %10 = vector.broadcast %cst_10 : f32 to vector<1x4xf32>
    %11 = arith.divf %9, %10 : vector<1x4xf32>
    %12 = vector.broadcast %11 : vector<1x4xf32> to vector<32x4xf32>
    %13 = arith.subf %5, %12 : vector<32x4xf32>
    %14 = arith.mulf %13, %13 : vector<32x4xf32>
    %cst_11 = arith.constant dense<0.000000e+00> : vector<4xf32>
    %15 = vector.multi_reduction <add>, %14, %cst_11 [0] : vector<32x4xf32> to vector<4xf32>
    %16 = vector.shape_cast %15 : vector<4xf32> to vector<1x4xf32>
    %cst_12 = arith.constant 3.200000e+01 : f32
    %17 = vector.broadcast %cst_12 : f32 to vector<1x4xf32>
    %18 = arith.divf %16, %17 : vector<1x4xf32>
    %19 = vector.broadcast %11 : vector<1x4xf32> to vector<32x4xf32>
    %20 = arith.subf %5, %19 : vector<32x4xf32>
    %cst_13 = arith.constant 9.99999974E-6 : f32
    %21 = vector.broadcast %cst_13 : f32 to vector<1x4xf32>
    %22 = arith.addf %18, %21 : vector<1x4xf32>
    %23 = math.rsqrt %22 : vector<1x4xf32>
    %24 = vector.broadcast %23 : vector<1x4xf32> to vector<32x4xf32>
    %25 = arith.mulf %20, %24 : vector<32x4xf32>
    %26 = vector.broadcast %6 : vector<32x1xf32> to vector<32x4xf32>
    %27 = arith.mulf %25, %26 : vector<32x4xf32>
    %28 = vector.broadcast %7 : vector<32x1xf32> to vector<32x4xf32>
    %29 = arith.addf %27, %28 : vector<32x4xf32>
    %cst_14 = arith.constant dense<0xFF800000> : vector<4xf32>
    %30 = vector.multi_reduction <maximumf>, %29, %cst_14 [0] : vector<32x4xf32> to vector<4xf32>
    %31 = vector.shape_cast %30 : vector<4xf32> to vector<1x4xf32>
    %32 = vector.broadcast %31 : vector<1x4xf32> to vector<32x4xf32>
    %33 = arith.subf %29, %32 : vector<32x4xf32>
    %34 = math.exp %33 : vector<32x4xf32>
    %cst_15 = arith.constant dense<0.000000e+00> : vector<4xf32>
    %35 = vector.multi_reduction <add>, %34, %cst_15 [0] : vector<32x4xf32> to vector<4xf32>
    %36 = vector.shape_cast %35 : vector<4xf32> to vector<1x4xf32>
    %37 = tpu.reciprocal %36 {approx = true} : vector<1x4xf32> -> vector<1x4xf32>
    %38 = vector.broadcast %37 : vector<1x4xf32> to vector<32x4xf32>
    %39 = arith.mulf %34, %38 : vector<32x4xf32>
    %c0_16 = arith.constant 0 : index
    %c0_17 = arith.constant 0 : index
    %40 = vector.load %arg6[%c0_16, %c0_17] : memref<24x32xf32, #tpu.memory_space<vmem>>, vector<24x32xf32>
    %cst_18 = arith.constant dense<0.000000e+00> : vector<24x4xf32>
    %41 = tpu.matmul %40, %39, %cst_18 {dimension_numbers = #tpu.dot_dimension_numbers<[1], [0], [0], [1], [0, 0, 1, 1], [], []>, precision = #tpu.contract_precision<fp32>} : vector<24x32xf32>, vector<32x4xf32>, vector<24x4xf32> -> vector<24x4xf32>
    %c0_19 = arith.constant 0 : index
    %c0_20 = arith.constant 0 : index
    %42 = vector.load %arg7[%c0_19, %c0_20] : memref<24x1xf32, #tpu.memory_space<vmem>>, vector<24x1xf32>
    %c0_21 = arith.constant 0 : index
    %c0_22 = arith.constant 0 : index
    %43 = vector.load %arg8[%c0_21, %c0_22] : memref<24x1xf32, #tpu.memory_space<vmem>>, vector<24x1xf32>
    %cst_23 = arith.constant dense<0.000000e+00> : vector<4xf32>
    %44 = vector.multi_reduction <add>, %41, %cst_23 [0] : vector<24x4xf32> to vector<4xf32>
    %45 = vector.shape_cast %44 : vector<4xf32> to vector<1x4xf32>
    %cst_24 = arith.constant 2.400000e+01 : f32
    %46 = vector.broadcast %cst_24 : f32 to vector<1x4xf32>
    %47 = arith.divf %45, %46 : vector<1x4xf32>
    %48 = vector.broadcast %47 : vector<1x4xf32> to vector<24x4xf32>
    %49 = arith.subf %41, %48 : vector<24x4xf32>
    %50 = arith.mulf %49, %49 : vector<24x4xf32>
    %cst_25 = arith.constant dense<0.000000e+00> : vector<4xf32>
    %51 = vector.multi_reduction <add>, %50, %cst_25 [0] : vector<24x4xf32> to vector<4xf32>
    %52 = vector.shape_cast %51 : vector<4xf32> to vector<1x4xf32>
    %cst_26 = arith.constant 2.400000e+01 : f32
    %53 = vector.broadcast %cst_26 : f32 to vector<1x4xf32>
    %54 = arith.divf %52, %53 : vector<1x4xf32>
    %55 = vector.broadcast %47 : vector<1x4xf32> to vector<24x4xf32>
    %56 = arith.subf %41, %55 : vector<24x4xf32>
    %cst_27 = arith.constant 9.99999974E-6 : f32
    %57 = vector.broadcast %cst_27 : f32 to vector<1x4xf32>
    %58 = arith.addf %54, %57 : vector<1x4xf32>
    %59 = math.rsqrt %58 : vector<1x4xf32>
    %60 = vector.broadcast %59 : vector<1x4xf32> to vector<24x4xf32>
    %61 = arith.mulf %56, %60 : vector<24x4xf32>
    %62 = vector.broadcast %42 : vector<24x1xf32> to vector<24x4xf32>
    %63 = arith.mulf %61, %62 : vector<24x4xf32>
    %64 = vector.broadcast %43 : vector<24x1xf32> to vector<24x4xf32>
    %65 = arith.addf %63, %64 : vector<24x4xf32>
    %cst_28 = arith.constant 5.000000e-01 : f32
    %66 = vector.broadcast %cst_28 : f32 to vector<24x4xf32>
    %67 = arith.mulf %66, %65 : vector<24x4xf32>
    %cst_29 = arith.constant 0.707106769 : f32
    %68 = vector.broadcast %cst_29 : f32 to vector<24x4xf32>
    %69 = arith.mulf %65, %68 : vector<24x4xf32>
    %cst_30 = arith.constant -4.000000e+00 : f32
    %cst_31 = arith.constant 4.000000e+00 : f32
    %70 = vector.broadcast %cst_30 : f32 to vector<24x4xf32>
    %71 = arith.maximumf %70, %69 : vector<24x4xf32>
    %72 = vector.broadcast %cst_31 : f32 to vector<24x4xf32>
    %73 = arith.minimumf %72, %71 : vector<24x4xf32>
    %74 = arith.mulf %73, %73 : vector<24x4xf32>
    %cst_32 = arith.constant -2.72614237E-10 : f32
    %75 = vector.broadcast %cst_32 : f32 to vector<24x4xf32>
    %76 = arith.mulf %75, %74 : vector<24x4xf32>
    %cst_33 = arith.constant 2.77068146E-8 : f32
    %77 = vector.broadcast %cst_33 : f32 to vector<24x4xf32>
    %78 = arith.addf %76, %77 : vector<24x4xf32>
    %79 = arith.mulf %78, %74 : vector<24x4xf32>
    %cst_34 = arith.constant -2.10102394E-6 : f32
    %80 = vector.broadcast %cst_34 : f32 to vector<24x4xf32>
    %81 = arith.addf %79, %80 : vector<24x4xf32>
    %82 = arith.mulf %81, %74 : vector<24x4xf32>
    %cst_35 = arith.constant -5.69250624E-5 : f32
    %83 = vector.broadcast %cst_35 : f32 to vector<24x4xf32>
    %84 = arith.addf %82, %83 : vector<24x4xf32>
    %85 = arith.mulf %84, %74 : vector<24x4xf32>
    %cst_36 = arith.constant -7.34990637E-4 : f32
    %86 = vector.broadcast %cst_36 : f32 to vector<24x4xf32>
    %87 = arith.addf %85, %86 : vector<24x4xf32>
    %88 = arith.mulf %87, %74 : vector<24x4xf32>
    %cst_37 = arith.constant -2.954600e-03 : f32
    %89 = vector.broadcast %cst_37 : f32 to vector<24x4xf32>
    %90 = arith.addf %88, %89 : vector<24x4xf32>
    %91 = arith.mulf %90, %74 : vector<24x4xf32>
    %cst_38 = arith.constant -0.0160960332 : f32
    %92 = vector.broadcast %cst_38 : f32 to vector<24x4xf32>
    %93 = arith.addf %91, %92 : vector<24x4xf32>
    %cst_39 = arith.constant -1.45660715E-5 : f32
    %94 = vector.broadcast %cst_39 : f32 to vector<24x4xf32>
    %95 = arith.mulf %94, %74 : vector<24x4xf32>
    %cst_40 = arith.constant -2.13374049E-4 : f32
    %96 = vector.broadcast %cst_40 : f32 to vector<24x4xf32>
    %97 = arith.addf %95, %96 : vector<24x4xf32>
    %98 = arith.mulf %97, %74 : vector<24x4xf32>
    %cst_41 = arith.constant -0.00168282702 : f32
    %99 = vector.broadcast %cst_41 : f32 to vector<24x4xf32>
    %100 = arith.addf %98, %99 : vector<24x4xf32>
    %101 = arith.mulf %100, %74 : vector<24x4xf32>
    %cst_42 = arith.constant -0.00737332925 : f32
    %102 = vector.broadcast %cst_42 : f32 to vector<24x4xf32>
    %103 = arith.addf %101, %102 : vector<24x4xf32>
    %104 = arith.mulf %103, %74 : vector<24x4xf32>
    %cst_43 = arith.constant -0.0142647391 : f32
    %105 = vector.broadcast %cst_43 : f32 to vector<24x4xf32>
    %106 = arith.addf %104, %105 : vector<24x4xf32>
    %107 = arith.mulf %73, %93 : vector<24x4xf32>
    %108 = tpu.reciprocal %106 : vector<24x4xf32> -> vector<24x4xf32>
    %109 = arith.mulf %107, %108 : vector<24x4xf32>
    %cst_44 = arith.constant 1.000000e+00 : f32
    %110 = vector.broadcast %cst_44 : f32 to vector<24x4xf32>
    %111 = arith.addf %110, %109 : vector<24x4xf32>
    %112 = arith.mulf %67, %111 : vector<24x4xf32>
    %c0_45 = arith.constant 0 : index
    %c0_46 = arith.constant 0 : index
    %113 = vector.load %arg9[%c0_45, %c0_46] : memref<24x4xf32, #tpu.memory_space<vmem>>, vector<24x4xf32>
    tpu.vector_store %arg9[%c0_45, %c0_46], %112 {strides = array<i32>} : memref<24x4xf32, #tpu.memory_space<vmem>>, vector<24x4xf32>,
    return
  }
  func.func @transform_0(%arg0: i32) -> (i32, i32) {
    %c0_i32 = arith.constant 0 : i32
    %c0_i32_0 = arith.constant 0 : i32
    return %arg0, %c0_i32 : i32, i32
  }
  func.func @transform_1(%arg0: i32) -> (i32, i32) {
    %c0_i32 = arith.constant 0 : i32
    %c0_i32_0 = arith.constant 0 : i32
    %c0_i32_1 = arith.constant 0 : i32
    return %c0_i32, %c0_i32_0 : i32, i32
  }
  func.func @transform_2(%arg0: i32) -> (i32, i32) {
    %c0_i32 = arith.constant 0 : i32
    %c0_i32_0 = arith.constant 0 : i32
    %c0_i32_1 = arith.constant 0 : i32
    return %c0_i32, %c0_i32_0 : i32, i32
  }
  func.func @transform_3(%arg0: i32) -> (i32, i32) {
    %c0_i32 = arith.constant 0 : i32
    %c0_i32_0 = arith.constant 0 : i32
    %c0_i32_1 = arith.constant 0 : i32
    return %c0_i32, %c0_i32_0 : i32, i32
  }
  func.func @transform_4(%arg0: i32) -> (i32, i32) {
    %c0_i32 = arith.constant 0 : i32
    %c0_i32_0 = arith.constant 0 : i32
    %c0_i32_1 = arith.constant 0 : i32
    return %c0_i32, %c0_i32_0 : i32, i32
  }
  func.func @transform_5(%arg0: i32) -> (i32, i32) {
    %c0_i32 = arith.constant 0 : i32
    %c0_i32_0 = arith.constant 0 : i32
    %c0_i32_1 = arith.constant 0 : i32
    return %c0_i32, %c0_i32_0 : i32, i32
  }
  func.func @transform_6(%arg0: i32) -> (i32, i32) {
    %c0_i32 = arith.constant 0 : i32
    %c0_i32_0 = arith.constant 0 : i32
    %c0_i32_1 = arith.constant 0 : i32
    return %c0_i32, %c0_i32_0 : i32, i32
  }
  func.func @transform_7(%arg0: i32) -> (i32, i32) {
    %c0_i32 = arith.constant 0 : i32
    %c0_i32_0 = arith.constant 0 : i32
    %c0_i32_1 = arith.constant 0 : i32
    return %c0_i32, %c0_i32_0 : i32, i32
  }
  func.func @transform_8(%arg0: i32) -> (i32, i32) {
    %c0_i32 = arith.constant 0 : i32
    %c0_i32_0 = arith.constant 0 : i32
    return %c0_i32, %arg0 : i32, i32
  }
}

</mosaic_0001>

<bundles_post_ra>
// kernel: tpu_custom_call.1
= control target key start
LH: loop header
LB: loop body
LE: loop exit
PB: predicated region body
PF: predicated region fallthrough
CT: control target
= control target key end

     0   :  { %v2454_v2 = vmov 0   ;;  %vm71_vm0 = vcmask 523264   ;;  %vm1309_vm1 = vcmask 31744   ;;  %vm2456_vm2 = vmmov 0   ;;  %s2996_s0 = inlined_call_operand.vmem [shape: f32[4,320], index: 0, kind: input, shape index: {}]   ;;  %s2997_s1 = inlined_call_operand.vmem [shape: f32[32,320], index: 1, kind: input, shape index: {}]   ;;  %s2998_s2 = inlined_call_operand.vmem [shape: f32[32,1], index: 2, kind: input, shape index: {}]   ;;  %s2999_s3 = inlined_call_operand.vmem [shape: f32[32,1], index: 3, kind: input, shape index: {}]   ;;  %s3000_s4 = inlined_call_operand.vmem [shape: f32[32,1], index: 4, kind: input, shape index: {}]   ;;  %s3001_s6 = inlined_call_operand.vmem [shape: f32[24,1], index: 6, kind: input, shape index: {}]   ;;  %s3002_s7 = inlined_call_operand.vmem [shape: f32[24,1], index: 7, kind: input, shape index: {}]   ;;  %s3003_s5 = inlined_call_operand.vmem [shape: f32[24,32], index: 5, kind: input, shape index: {}]   ;;  %s3004_s8 = inlined_call_operand.vmem [shape: f32[24,4], index: 8, kind: output, shape index: {}]  }
   0x1   :  { %v29_v0 = vld [vmem:[%s2996_s0] sm:$0xff]  ;;  %v32_v1 = vld [vmem:[%s2997_s1 + $0x8] sm:$0xff]  ;;  %2431 = vset.pattern.permute.xlu0 %v2454_v2  ;;  %2432 = vset.pattern.permute.xlu1 %v2454_v2  ;;  %v34_v8 = vld [vmem:[%s2997_s1 + $0x18] sm:$0xff]  ;;  %vm1447_vm3 = vcmask 261120  }
   0x2   :  { %v69_v3 = vcombine.high %v29_v0, %v29_v0  ;;  %v2508_v4 = vand.u32 4294901760, %v29_v0  ;;  %v2510_v5 = vand.u32 4294901760, %v32_v1  ;;  %v31_v6 = vld [vmem:[%s2997_s1] sm:$0xff]  ;;  %v2525_v11 = vand.u32 4294901760, %v34_v8  ;;  %v38_v12 = vld [vmem:[%s2997_s1 + $0x38] sm:$0xff]  ;;  %v37_v13 = vld [vmem:[%s2997_s1 + $0x30] sm:$0xff] }
   0x3   :  { %v35_v7 = vld [vmem:[%s2997_s1 + $0x20] sm:$0xff]  ;;  %v2521_v9 = vand.u32 4294901760, %v31_v6  ;;  %v2542_v17 = vand.u32 4294901760, %v38_v12  ;;  %v2553_v21 = vand.u32 4294901760, %v37_v13  ;;  %v45_v27 = vld [vmem:[%s2998_s2 + $0x10] sm:$0xff]  ;;  %v44_v36 = vld [vmem:[%s2998_s2 + $0x8] sm:$0xff] }
   0x4   :  { %v2523_v10 = vand.u32 4294901760, %v35_v7  ;;  %v2533_v14 = vand.u32 4294901760, %v69_v3  ;;  %v2536_v15 = vsub.f32 %v32_v1, %v2510_v5  ;;  %v2539_v16 = vsub.f32 %v29_v0, %v2508_v4  ;;  %288 = vmatprep.mubr.f32.mxu1 %v2510_v5  ;;  %v43_v26 = vld [vmem:[%s2998_s2] sm:$0xff]  ;;  %59 = vperm.xlu1 %2432, %v45_v27   ;;  %v41_v41 = vld [vmem:[%s2997_s1 + $0x50] sm:$0xff]  ;;  %v40_v42 = vld [vmem:[%s2997_s1 + $0x48] sm:$0xff] }
   0x5   :  { %v2545_v18 = vsub.f32 %v31_v6, %v2521_v9  ;;  %v2551_v20 = vsub.f32 %v34_v8, %v2525_v11  ;;  %v2560_v25 = vsub.f32 %v38_v12, %v2542_v17  ;;  %v2573_v31 = vsub.f32 %v37_v13, %v2553_v21  ;;  %49 = vperm.xlu0 %2431, %v43_v26   ;;  %v46_v43 = vld [vmem:[%s2998_s2 + $0x18] sm:$0xff]  ;;  %v30_v44 = vld [vmem:[%s2996_s0 + $0x8] sm:$0xf]  ;;  %v1301_v60 = vld [vmem:[%s2999_s3] sm:$0xff] }
   0x6   :  { %v2548_v19 = vsub.f32 %v35_v7, %v2523_v10  ;;  %117 = vmatprep.subr.mxu0 %v2533_v14  ;;  %v154_v22 = vand.u32 4294901760, %v2536_v15  ;;  %v244_v23 = vsub.f32 %v69_v3, %v2533_v14  ;;  %v251_v24 = vand.u32 4294901760, %v2539_v16  ;;  %v1302_v1 = vld [vmem:[%s2999_s3 + $0x8] sm:$0xff]  ;;  %v1303_v6 = vld [vmem:[%s2999_s3 + $0x10] sm:$0xff]  ;;  %v1304_v13 = vld [vmem:[%s2999_s3 + $0x18] sm:$0xff] }
   0x7   :  { %119 = vmatpush1.xpose.msra.mxu0 %v2508_v4  ;;  %v160_v28 = vand.u32 4294901760, %v2545_v18  ;;  %v175_v30 = vand.u32 4294901760, %v2551_v20  ;;  %v184_v35 = vand.u32 4294901760, %v2560_v25  ;;  %v190_v40 = vand.u32 4294901760, %v2573_v31  ;;  %v1306_v26 = vld [vmem:[%s3000_s4 + $0x8] sm:$0xff]  ;;  %v1307_v27 = vld [vmem:[%s3000_s4 + $0x10] sm:$0xff] }
   0x8   :  { %v169_v29 = vand.u32 4294901760, %v2548_v19  ;;  %v155_v32 = vsub.f32 %v2536_v15, %v154_v22  ;;  %v245_v33 = vand.u32 4294901760, %v244_v23  ;;  %v252_v34 = vsub.f32 %v2539_v16, %v251_v24  ;;  %348 = vmatprep.subr.mxu0 %v244_v23  ;;  %64 = vperm.xlu1 %2432, %v46_v43  }
   0x9   :  { %v161_v37 = vsub.f32 %v2545_v18, %v160_v28  ;;  %v176_v39 = vsub.f32 %v2551_v20, %v175_v30  ;;  %v185_v47 = vsub.f32 %v2560_v25, %v184_v35  ;;  %54 = vperm.xlu0 %2431, %v44_v36   ;;  %v2610_v52 = vand.u32 4294901760, %v41_v41 }
   0xa   :  { %v170_v38 = vsub.f32 %v2548_v19, %v169_v29  ;;  %v156_v45 = vand.u32 4294901760, %v155_v32  ;;  %v246_v46 = vsub.f32 %v244_v23, %v245_v33  ;;  %v253_v49 = vand.u32 4294901760, %v252_v34  ;;  %v1305_v23 = vld [vmem:[%s3000_s4] sm:$0xff] }
   0xb   :  { %v162_v48 = vand.u32 4294901760, %v161_v37  ;;  %v2612_v53 = vand.u32 4294901760, %v40_v42  ;;  %v84_v54 = vsel %vm71_vm0, %v30_v44, 0  ;;  %v177_v55 = vand.u32 4294901760, %v176_v39  ;;  %v2028_v34 = vld [vmem:[%s3001_s6] sm:$0xff]  ;;  %v33_v37 = vld [vmem:[%s2997_s1 + $0x10] sm:$0xff] }
   0xc   :  { %v171_v50 = vand.u32 4294901760, %v170_v38  ;;  %157 = vmatprep.mubr.f32.mxu0 %v156_v45  ;;  %v247_v51 = vand.u32 4294901760, %v246_v46  ;;  %v191_v56 = vsub.f32 %v2573_v31, %v190_v40  ;;  %v186_v57 = vand.u32 4294901760, %v185_v47  ;;  %1360 = vperm.xlu1 %2432, %v1302_v1   ;;  %v2029_v38 = vld [vmem:[%s3001_s6 + $0x8] sm:$0xff]  ;;  %v2033_v39 = vld [vmem:[%s3002_s7 + $0x10] sm:$0xff] }
   0xd   :  { %163 = vmatmul.mubr.f32.vlgmr.msra.gmra.mxu0 %v162_v48  ;;  %v2619_v58 = vsub.f32 %v41_v41, %v2610_v52  ;;  %v2622_v59 = vsub.f32 %v40_v42, %v2612_v53  ;;  %v2628_v61 = vand.u32 4294901760, %v84_v54  ;;  %1355 = vperm.xlu0 %2431, %v1301_v60  }
   0xe   :  { %248 = vmatprep.subr.mxu1 %v247_v51  ;;  %172 = vmatprep.mubr.f32.mxu0 %v171_v50  ;;  %v192_v0 = vand.u32 4294901760, %v191_v56 }
   0xf   :  { %254 = vmatpush1.xpose.msra.mxu1 %v253_v49  ;;  %351 = vmatpush1.xpose.msra.mxu0 %v2539_v16  ;;  %v199_v62 = vand.u32 4294901760, %v2619_v58  ;;  %v205_v63 = vand.u32 4294901760, %v2622_v59  ;;  %v2650_v8 = vsub.f32 %v84_v54, %v2628_v61  ;;  %v73_v16 = vsel %vm71_vm0, %v33_v37, 0 }
  0x10   :  { %452 = vmatprep.subr.mxu1 %v2533_v14  ;;  %565 = vmatprep.subr.mxu0 %v245_v33  ;;  %v1308_v33 = vld [vmem:[%s3000_s4 + $0x18] sm:$0xff] }
  0x11   :  { %178 = vmatmul.mubr.f32.gmra.mxu0 %v177_v55  ;;  %v200_v2 = vsub.f32 %v2619_v58, %v199_v62  ;;  %v206_v3 = vsub.f32 %v2622_v59, %v205_v63  ;;  %1365 = vperm.xlu0 %2431, %v1303_v6  }
  0x12   :  { %290 = vmatmul.mubr.f32.vlgmr.msra.gmra.mxu1 %v2521_v9  ;;  %187 = vmatprep.mubr.f32.mxu0 %v186_v57 }
  0x13   :  { %454 = vmatpush1.xpose.msra.mxu1 %v2508_v4  ;;  %295 = vmatprep.mubr.f32.mxu1 %v2523_v10  ;;  %v201_v7 = vand.u32 4294901760, %v200_v2  ;;  %v207_v12 = vand.u32 4294901760, %v206_v3 }
  0x14   :  { %662 = vmatprep.subr.mxu1 %v2533_v14  ;;  %v2661_v14 = vand.u32 4294901760, %v2650_v8  ;;  %1370 = vperm.xlu1 %2432, %v1304_v13  }
  0x15   :  { %193 = vmatmul.mubr.f32.gmra.mxu0 %v192_v0  ;;  %1379 = vperm.xlu0 %2431, %v1305_v23  }
  0x16   :  { %297 = vmatmul.mubr.f32.gmra.mxu1 %v2525_v11  ;;  %202 = vmatprep.mubr.f32.mxu0 %v201_v7  ;;  %v866_v32 = vsub.f32 %v2650_v8, %v2661_v14 }
  0x17   :  { %302 = vmatprep.mubr.f32.mxu1 %v2542_v17 }
  0x18   :  { %1384 = vperm.xlu1 %2432, %v1306_v26   ;;  %v867_v36 = vand.u32 4294901760, %v866_v32 }
  0x19   :  { %208 = vmatmul.mubr.f32.gmra.mxu0 %v207_v12  ;;  %1389 = vperm.xlu0 %2431, %v1307_v27  }
  0x1a   :  { %304 = vmatmul.mubr.f32.gmra.mxu1 %v2553_v21  ;;  %386 = vmatprep.mubr.f32.mxu0 %v2536_v15  ;;  %v2030_v15 = vld [vmem:[%s3001_s6 + $0x10] sm:$0xff] }
  0x1b   :  { %309 = vmatprep.mubr.f32.mxu1 %v2610_v52 }
  0x1c   :  { %1394 = vperm.xlu1 %2432, %v1308_v33  }
  0x1d   :  { %389 = vmatmul.mubr.f32.vlgmr.msra.gmra.mxu0 %v2545_v18  ;;  %2072 = vperm.xlu0 %2431, %v2028_v34   ;;  %v39_v18 = vld [vmem:[%s2997_s1 + $0x40] sm:$0xff] }
  0x1e   :  { %311 = vmatmul.mubr.f32.gmra.mxu1 %v2612_v53  ;;  %395 = vmatprep.mubr.f32.mxu0 %v2548_v19  ;;  %v2718_v19 = vand.u32 4294901760, %v73_v16 }
  0x1f   :  { %490 = vmatprep.mubr.f32.mxu1 %v154_v22  ;;  %569 = vmatpush1.xpose.msra.mxu0 %v251_v24  ;;  %v36_v22 = vld [vmem:[%s2997_s1 + $0x28] sm:$0xff] }
  0x20   :  { %2278 = vmatprep.subr.mxu0 %v2628_v61  ;;  %2077 = vperm.xlu1 %2432, %v2029_v38   ;;  %v76_v24 = vsel %vm71_vm0, %v36_v22, 0 }
  0x21   :  { %398 = vmatmul.mubr.f32.gmra.mxu0 %v2551_v20  ;;  %2082 = vperm.xlu0 %2431, %v2030_v15   ;;  %v42_v20 = vld [vmem:[%s2997_s1 + $0x58] sm:$0xff] }
  0x22   :  { %494 = vmatmul.mubr.f32.vlgmr.msra.gmra.mxu1 %v160_v28  ;;  %404 = vmatprep.mubr.f32.mxu0 %v2560_v25  ;;  %v2032_v28 = vld [vmem:[%s3002_s7 + $0x8] sm:$0xff]  ;;  %v793_v25 = vsub.f32 %v73_v16, %v2718_v19  ;;  %v82_v41 = vsel %vm71_vm0, %v42_v20, 0 }
  0x23   :  { %664 = vmatpush1.xpose.msra.mxu1 %v2508_v4  ;;  %501 = vmatprep.mubr.f32.mxu1 %v169_v29  ;;  %v2031_v4 = vld [vmem:[%s3002_s7] sm:$0xff]  ;;  %v79_v29 = vsel %vm71_vm0, %v39_v18, 0  ;;  %v822_v43 = vand.u32 4294901760, %v82_v41 }
  0x24   :  { %2286 = vmatprep.subr.mxu1 %v867_v36  ;;  %2090 = vperm.xlu1 %2432, %v2031_v4  }
  0x25   :  { %407 = vmatmul.mubr.f32.gmra.mxu0 %v2573_v31  ;;  %2095 = vperm.xlu0 %2431, %v2032_v28   ;;  %v794_v31 = vand.u32 4294901760, %v793_v25  ;;  %v823_v45 = vsub.f32 %v82_v41, %v822_v43 }
  0x26   :  { %505 = vmatmul.mubr.f32.gmra.mxu1 %v175_v30  ;;  %413 = vmatprep.mubr.f32.mxu0 %v2619_v58  ;;  %v2731_v30 = vand.u32 4294901760, %v76_v24 }
  0x27   :  { %512 = vmatprep.mubr.f32.mxu1 %v184_v35  ;;  %v2740_v35 = vand.u32 4294901760, %v79_v29  ;;  %v795_v46 = vsub.f32 %v793_v25, %v794_v31  ;;  %v824_v48 = vand.u32 4294901760, %v823_v45 }
  0x28   :  { %2100 = vperm.xlu1 %2432, %v2033_v39   ;;  %v803_v42 = vsub.f32 %v76_v24, %v2731_v30 }
  0x29   :  { %416 = vmatmul.mubr.f32.gmra.mxu0 %v2622_v59  ;;  %v796_v49 = vand.u32 4294901760, %v795_v46  ;;  %v825_v51 = vsub.f32 %v823_v45, %v824_v48 }
  0x2a   :  { %516 = vmatmul.mubr.f32.gmra.mxu1 %v190_v40  ;;  %603 = vmatprep.mubr.f32.mxu0 %v2510_v5  ;;  %v813_v40 = vsub.f32 %v79_v29, %v2740_v35  ;;  %v804_v44 = vand.u32 4294901760, %v803_v42 }
  0x2b   :  { %523 = vmatprep.mubr.f32.mxu1 %v199_v62  ;;  %v826_v54 = vand.u32 4294901760, %v825_v51 }
  0x2c   :  { %v814_v47 = vand.u32 4294901760, %v813_v40 }
  0x2d   :  { %605 = vmatmul.mubr.f32.vlgmr.msra.gmra.mxu0 %v2521_v9 }
  0x2e   :  { %527 = vmatmul.mubr.f32.gmra.mxu1 %v205_v63  ;;  %610 = vmatprep.mubr.f32.mxu0 %v2523_v10  ;;  %v815_v50 = vsub.f32 %v813_v40, %v814_v47 }
  0x2f   :  { %698 = vmatprep.mubr.f32.mxu1 %v2510_v5  ;;  %2279 = vmatpush3.xpose.msra.mxu0 %v2628_v61  ;;  %v805_v5 = vsub.f32 %v803_v42, %v804_v44 }
  0x30   :  { %2294 = vmatprep.subr.mxu0 %v2650_v8 }
  0x31   :  { %612 = vmatmul.mubr.f32.gmra.mxu0 %v2525_v11 }
  0x32   :  { %700 = vmatmul.mubr.f32.vlgmr.msra.gmra.mxu1 %v2521_v9  ;;  %617 = vmatprep.mubr.f32.mxu0 %v2542_v17  ;;  %v806_v9 = vand.u32 4294901760, %v805_v5 }
  0x33   :  { %2287 = vmatpush3.xpose.msra.mxu1 %v867_v36  ;;  %705 = vmatprep.mubr.f32.mxu1 %v2523_v10  ;;  %v816_v10 = vand.u32 4294901760, %v815_v50 }
  0x34   :  { %2302 = vmatprep.subr.mxu1 %v2628_v61 }
  0x35   :  { %619 = vmatmul.mubr.f32.gmra.mxu0 %v2553_v21 }
  0x36   :  { %707 = vmatmul.mubr.f32.gmra.mxu1 %v2525_v11  ;;  %624 = vmatprep.mubr.f32.mxu0 %v2610_v52 }
  0x37   :  { %712 = vmatprep.mubr.f32.mxu1 %v2542_v17 }
  0x39   :  { %626 = vmatmul.mubr.f32.gmra.mxu0 %v2612_v53 }
  0x3a   :  { %714 = vmatmul.mubr.f32.gmra.mxu1 %v2553_v21  ;;  %2280 = vmatprep.mubr.f32.mxu0 %v796_v49 }
  0x3b   :  { %719 = vmatprep.mubr.f32.mxu1 %v2610_v52 }
  0x3d   :  { %2281 = vmatmul.mubr.f32.vlgmr.msra.gmra.mxu0 %v806_v9 }
  0x3e   :  { %721 = vmatmul.mubr.f32.gmra.mxu1 %v2612_v53  ;;  %2283 = vmatprep.mubr.f32.mxu0 %v816_v10 }
  0x3f   :  { %2288 = vmatprep.mubr.f32.mxu1 %v2718_v19  ;;  %2295 = vmatpush3.xpose.msra.mxu0 %v2650_v8 }
  0x40   :  { %2310 = vmatprep.subr.mxu0 %v2661_v14 }
  0x41   :  { %2284 = vmatmul.mubr.f32.gmra.mxu0 %v826_v54 }
  0x42   :  { %2289 = vmatmul.mubr.f32.vlgmr.msra.gmra.mxu1 %v2731_v30  ;;  %2296 = vmatprep.mubr.f32.mxu0 %v793_v25 }
  0x43   :  { %2303 = vmatpush3.xpose.msra.mxu1 %v2628_v61  ;;  %2291 = vmatprep.mubr.f32.mxu1 %v2740_v35 }
  0x44   :  { %2318 = vmatprep.subr.mxu1 %v2628_v61 }
  0x45   :  { %2297 = vmatmul.mubr.f32.vlgmr.msra.gmra.mxu0 %v803_v42 }
  0x46   :  { %2292 = vmatmul.mubr.f32.gmra.mxu1 %v822_v43  ;;  %2299 = vmatprep.mubr.f32.mxu0 %v813_v40 }
  0x47   :  { %2304 = vmatprep.mubr.f32.mxu1 %v794_v31  ;;  %2311 = vmatpush3.xpose.msra.mxu0 %v2661_v14 }
  0x49   :  { %2300 = vmatmul.mubr.f32.gmra.mxu0 %v823_v45 }
  0x4a   :  { %2305 = vmatmul.mubr.f32.vlgmr.msra.gmra.mxu1 %v804_v44  ;;  %2312 = vmatprep.mubr.f32.mxu0 %v2718_v19 }
  0x4b   :  { %2319 = vmatpush3.xpose.msra.mxu1 %v2628_v61  ;;  %2307 = vmatprep.mubr.f32.mxu1 %v814_v47 }
  0x4d   :  { %2313 = vmatmul.mubr.f32.vlgmr.msra.gmra.mxu0 %v2731_v30 }
  0x4e   :  { %2308 = vmatmul.mubr.f32.gmra.mxu1 %v824_v48  ;;  %2315 = vmatprep.mubr.f32.mxu0 %v2740_v35 }
  0x4f   :  { %2320 = vmatprep.mubr.f32.mxu1 %v2718_v19 }
  0x51   :  { %2316 = vmatmul.mubr.f32.gmra.mxu0 %v822_v43 }
  0x52   :  { %2321 = vmatmul.mubr.f32.vlgmr.msra.gmra.mxu1 %v2731_v30 }
  0x53   :  { %2323 = vmatprep.mubr.f32.mxu1 %v2740_v35 }
  0x56   :  { %2324 = vmatmul.mubr.f32.gmra.mxu1 %v822_v43 }
  0x7f   :  { %v60_v18 = vpop.permute.xlu1 %59 }
  0x80   :  { %v50_v15 = vpop.permute.xlu0 %49 }
  0x83   :  { %v65_v39 = vpop.permute.xlu1 %64 }
  0x84   :  { %v55_v29 = vpop.permute.xlu0 %54 }
  0xcd   :  { %v164_v11 = vpop.f32.mrf.mxu0 }
  0xce   :  { %v165_v35 = vadd.f32 %v164_v11, %v50_v15 }
  0xcf   :  { %v166_v17 = vpop.f32.mrf.mxu0 }
  0xd1   :  { %v179_v21 = vpop.f32.mrf.mxu0 }
  0xd2   :  { %v291_v52 = vpop.f32.mrf.mxu1  ;;  %v180_v41 = vadd.f32 %v179_v21, %v55_v29 }
  0xd3   :  { %v181_v53 = vpop.f32.mrf.mxu0  ;;  %v292_v45 = vadd.f32 %v291_v52, %v165_v35 }
  0xd4   :  { %v293_v55 = vpop.f32.mrf.mxu1 }
  0xd5   :  { %v194_v56 = vpop.f32.mrf.mxu0 }
  0xd6   :  { %v298_v57 = vpop.f32.mrf.mxu1  ;;  %v195_v47 = vadd.f32 %v194_v56, %v60_v18 }
  0xd7   :  { %v196_v58 = vpop.f32.mrf.mxu0  ;;  %v299_v46 = vadd.f32 %v298_v57, %v180_v41 }
  0xd8   :  { %v300_v59 = vpop.f32.mrf.mxu1 }
  0xd9   :  { %v209_v60 = vpop.f32.mrf.mxu0 }
  0xda   :  { %v305_v61 = vpop.f32.mrf.mxu1  ;;  %v210_v31 = vadd.f32 %v209_v60, %v65_v39 }
  0xdb   :  { %v211_v62 = vpop.f32.mrf.mxu0  ;;  %v306_v54 = vadd.f32 %v305_v61, %v195_v47 }
  0xdc   :  { %v307_v63 = vpop.f32.mrf.mxu1 }
  0xdd   :  { %v390_v0 = vpop.f32.mrf.mxu0 }
  0xde   :  { %v312_v1 = vpop.f32.mrf.mxu1  ;;  %v391_v49 = vadd.f32 %v390_v0, %v292_v45 }
  0xdf   :  { %v392_v2 = vpop.f32.mrf.mxu0  ;;  %v313_v50 = vadd.f32 %v312_v1, %v210_v31 }
  0xe0   :  { %v314_v3 = vpop.f32.mrf.mxu1 }
  0xe1   :  { %v399_v6 = vpop.f32.mrf.mxu0 }
  0xe2   :  { %v495_v7 = vpop.f32.mrf.mxu1  ;;  %v400_v9 = vadd.f32 %v399_v6, %v299_v46  ;;  %v2455_v46 = vmov 0.0  }
  0xe3   :  { %v401_v8 = vpop.f32.mrf.mxu0  ;;  %v496_v17 = vadd.f32 %v495_v7, %v391_v49  ;;  %2326 = vmatprep.subr.mxu0 %v2455_v46  ;;  %2343 = vmatprep.subr.mxu1 %v2455_v46 }
  0xe4   :  { %v497_v12 = vpop.f32.mrf.mxu1  ;;  %2334 = vmatprep.mubr.msk.f32.mxu0 %vm2456_vm2, %v2455_v46  ;;  %2351 = vmatprep.mubr.msk.f32.mxu1 %vm2456_vm2, %v2455_v46 }
  0xe5   :  { %v408_v13 = vpop.f32.mrf.mxu0 }
  0xe6   :  { %v506_v23 = vpop.f32.mrf.mxu1  ;;  %v409_v58 = vadd.f32 %v408_v13, %v306_v54 }
  0xe7   :  { %v410_v14 = vpop.f32.mrf.mxu0  ;;  %v507_v53 = vadd.f32 %v506_v23, %v400_v9 }
  0xe8   :  { %v508_v26 = vpop.f32.mrf.mxu1 }
  0xe9   :  { %v417_v27 = vpop.f32.mrf.mxu0 }
  0xea   :  { %v517_v32 = vpop.f32.mrf.mxu1  ;;  %v418_v11 = vadd.f32 %v417_v27, %v313_v50 }
  0xeb   :  { %v419_v33 = vpop.f32.mrf.mxu0  ;;  %v518_v56 = vadd.f32 %v517_v32, %v409_v58 }
  0xec   :  { %v519_v34 = vpop.f32.mrf.mxu1 }
  0xed   :  { %v606_v36 = vpop.f32.mrf.mxu0 }
  0xee   :  { %v528_v37 = vpop.f32.mrf.mxu1  ;;  %v607_v59 = vadd.f32 %v606_v36, %v496_v17 }
  0xef   :  { %v608_v38 = vpop.f32.mrf.mxu0  ;;  %v529_v60 = vadd.f32 %v528_v37, %v418_v11 }
  0xf0   :  { %v530_v16 = vpop.f32.mrf.mxu1 }
  0xf1   :  { %v613_v22 = vpop.f32.mrf.mxu0 }
  0xf2   :  { %v701_v4 = vpop.f32.mrf.mxu1  ;;  %v614_v62 = vadd.f32 %v613_v22, %v507_v53 }
  0xf3   :  { %v615_v19 = vpop.f32.mrf.mxu0  ;;  %v702_v63 = vadd.f32 %v701_v4, %v607_v59 }
  0xf4   :  { %v703_v24 = vpop.f32.mrf.mxu1 }
  0xf5   :  { %v620_v28 = vpop.f32.mrf.mxu0 }
  0xf6   :  { %v708_v20 = vpop.f32.mrf.mxu1  ;;  %v621_v6 = vadd.f32 %v620_v28, %v518_v56 }
  0xf7   :  { %v622_v30 = vpop.f32.mrf.mxu0  ;;  %v709_v2 = vadd.f32 %v708_v20, %v614_v62 }
  0xf8   :  { %v710_v25 = vpop.f32.mrf.mxu1 }
  0xf9   :  { %v627_v42 = vpop.f32.mrf.mxu0 }
  0xfa   :  { %v715_v43 = vpop.f32.mrf.mxu1  ;;  %v628_v0 = vadd.f32 %v627_v42, %v529_v60 }
  0xfb   :  { %v629_v40 = vpop.f32.mrf.mxu0  ;;  %v716_v14 = vadd.f32 %v715_v43, %v621_v6 }
  0xfc   :  { %v717_v44 = vpop.f32.mrf.mxu1 }
  0xfd   :  { %v2282_v5 = vpop.f32.mrf.mxu0 }
  0xfe   :  { %v722_v48 = vpop.f32.mrf.mxu1  ;;  %v809_v8 = vadd.f32 %v2282_v5, %v709_v2 }
  0xff   :  { %v798_v51 = vpop.f32.mrf.mxu0  ;;  %v723_v61 = vadd.f32 %v722_v48, %v628_v0 }
 0x100   :  { %v724_v10 = vpop.f32.mrf.mxu1  ;;  %v799_v7 = vadd.f32 %v798_v51, %v702_v63 }
 0x101   :  { %v2285_v21 = vpop.f32.mrf.mxu0 }
 0x102   :  { %v2290_v55 = vpop.f32.mrf.mxu1  ;;  %v829_v34 = vadd.f32 %v2285_v21, %v723_v61 }
 0x103   :  { %v818_v52 = vpop.f32.mrf.mxu0  ;;  %v911_v26 = vadd.f32 %v2290_v55, %v809_v8 }
 0x104   :  { %v904_v57 = vpop.f32.mrf.mxu1  ;;  %v819_v36 = vadd.f32 %v818_v52, %v716_v14 }
 0x105   :  { %v2298_v1 = vpop.f32.mrf.mxu0  ;;  %v905_v13 = vadd.f32 %v904_v57, %v799_v7 }
 0x106   :  { %v2293_v3 = vpop.f32.mrf.mxu1  ;;  %v1004_v38 = vadd.f32 %v2298_v1, %v911_v26 }
 0x107   :  { %v996_v12 = vpop.f32.mrf.mxu0  ;;  %v923_v15 = vadd.f32 %v2293_v3, %v829_v34 }
 0x108   :  { %v916_v23 = vpop.f32.mrf.mxu1  ;;  %v997_v16 = vadd.f32 %v996_v12, %v905_v13 }
 0x109   :  { %v2301_v27 = vpop.f32.mrf.mxu0  ;;  %v917_v22 = vadd.f32 %v916_v23, %v819_v36 }
 0x10a   :  { %v2306_v33 = vpop.f32.mrf.mxu1  ;;  %v1018_v20 = vadd.f32 %v2301_v27, %v923_v15 }
 0x10b   :  { %v1010_v37 = vpop.f32.mrf.mxu0  ;;  %v1100_v19 = vadd.f32 %v2306_v33, %v1004_v38 }
 0x10c   :  { %v1091_v32 = vpop.f32.mrf.mxu1  ;;  %v1011_v30 = vadd.f32 %v1010_v37, %v917_v22  ;;  %v1361_v22 = vpop.permute.xlu1 %1360 }
 0x10d   :  { %v2314_v18 = vpop.f32.mrf.mxu0  ;;  %v1092_v24 = vadd.f32 %v1091_v32, %v997_v16  ;;  %v1356_v16 = vpop.permute.xlu0 %1355 }
 0x10e   :  { %v2309_v4 = vpop.f32.mrf.mxu1  ;;  %v1196_v35 = vadd.f32 %v2314_v18, %v1100_v19 }
 0x10f   :  { %v1189_v28 = vpop.f32.mrf.mxu0  ;;  %v1116_v41 = vadd.f32 %v2309_v4, %v1018_v20 }
 0x110   :  { %v1107_v29 = vpop.f32.mrf.mxu1  ;;  %v1190_v42 = vadd.f32 %v1189_v28, %v1092_v24  ;;  %v1371_v4 = vpop.permute.xlu1 %1370 }
 0x111   :  { %v2317_v39 = vpop.f32.mrf.mxu0  ;;  %v1108_v43 = vadd.f32 %v1107_v29, %v1011_v30  ;;  %v1366_v18 = vpop.permute.xlu0 %1365 }
 0x112   :  { %v2322_v25 = vpop.f32.mrf.mxu1  ;;  %v1208_v5 = vadd.f32 %v2317_v39, %v1116_v41 }
 0x113   :  { %v1201_v31 = vpop.f32.mrf.mxu0  ;;  %v1286_v44 = vadd.f32 %v2322_v25, %v1196_v35 }
 0x114   :  { %v1279_v40 = vpop.f32.mrf.mxu1  ;;  %v1202_v48 = vadd.f32 %v1201_v31, %v1108_v43  ;;  %v1385_v24 = vpop.permute.xlu1 %1384 }
 0x115   :  { %v1280_v45 = vadd.f32 %v1279_v40, %v1190_v42  ;;  %v1311_v9 = vsel %vm1309_vm1, %v1286_v44, 0.0  ;;  %v1380_v19 = vpop.permute.xlu0 %1379 }
 0x116   :  { %v2325_v47 = vpop.f32.mrf.mxu1 }
 0x117   :  { %v1310_v49 = vsel %vm1309_vm1, %v1280_v45, 0.0  ;;  %v1298_v51 = vadd.f32 %v2325_v47, %v1208_v5 }
 0x118   :  { %v1291_v50 = vpop.f32.mrf.mxu1  ;;  %v1312_v54 = vadd.f32 %v1311_v9, %v1310_v49  ;;  %v1395_v31 = vpop.permute.xlu1 %1394 }
 0x119   :  { %v1292_v10 = vadd.f32 %v1291_v50, %v1202_v48  ;;  %v1315_v11 = vsel %vm1309_vm1, %v1298_v51, 0.0  ;;  %v1390_v43 = vpop.permute.xlu0 %1389 }
 0x11b   :  { %v1313_v17 = vsel %vm1309_vm1, %v1292_v10, 0.0 }
 0x11c   :  { %v1314_v53 = vadd.f32 %v1313_v17, %v1312_v54 }
 0x11e   :  { %v1316_v21 = vadd.f32 %v1315_v11, %v1314_v53 }
 0x120   :  { %v1317_v55 = vrot.slane %v1316_v21, 4 }
 0x122   :  { %v1318_v58 = vadd.f32 %v1317_v55, %v1316_v21 }
 0x124   :  { %v1319_v59 = vrot.slane %v1318_v58, 2 }
 0x126   :  { %v1320_v60 = vadd.f32 %v1319_v59, %v1318_v58 }
 0x128   :  { %v1321_v62 = vrot.slane %v1320_v60, 1 }
 0x12a   :  { %v1322_v52 = vadd.f32 %v1321_v62, %v1320_v60 }
 0x12c   :  { %v1324_v57 = vmul.f32 0.03125, %v1322_v52 }
 0x12e   :  { %v1325_v56 = vsub.f32 %v1280_v45, %v1324_v57  ;;  %v1326_v63 = vsub.f32 %v1286_v44, %v1324_v57  ;;  %v1327_v2 = vsub.f32 %v1292_v10, %v1324_v57  ;;  %v1328_v0 = vsub.f32 %v1298_v51, %v1324_v57 }
 0x130   :  { %v1329_v1 = vmul.f32 %v1325_v56, %v1325_v56  ;;  %v1330_v3 = vmul.f32 %v1326_v63, %v1326_v63  ;;  %v1331_v6 = vmul.f32 %v1327_v2, %v1327_v2  ;;  %v1332_v8 = vmul.f32 %v1328_v0, %v1328_v0 }
 0x132   :  { %v1333_v61 = vsel %vm1309_vm1, %v1329_v1, 0.0  ;;  %v1334_v7 = vsel %vm1309_vm1, %v1330_v3, 0.0  ;;  %v1336_v23 = vsel %vm1309_vm1, %v1331_v6, 0.0  ;;  %v1338_v26 = vsel %vm1309_vm1, %v1332_v8, 0.0 }
 0x133   :  { %v1335_v12 = vadd.f32 %v1334_v7, %v1333_v61 }
 0x135   :  { %v1337_v14 = vadd.f32 %v1336_v23, %v1335_v12 }
 0x137   :  { %v1339_v13 = vadd.f32 %v1338_v26, %v1337_v14 }
 0x139   :  { %v1340_v27 = vrot.slane %v1339_v13, 4 }
 0x13b   :  { %v1341_v33 = vadd.f32 %v1340_v27, %v1339_v13 }
 0x13d   :  { %v1342_v34 = vrot.slane %v1341_v33, 2 }
 0x13f   :  { %v1343_v36 = vadd.f32 %v1342_v34, %v1341_v33 }
 0x141   :  { %v1344_v37 = vrot.slane %v1343_v36, 1 }
 0x143   :  { %v1345_v32 = vadd.f32 %v1344_v37, %v1343_v36  ;;  %v1444_v37 = vld [vmem:[%s3003_s5] sm:$0xff] }
 0x145   :  { %v1346_v38 = vmul.f32 0.03125, %v1345_v32  ;;  %v1449_v32 = vsel %vm1447_vm3, %v1444_v37, 0 }
 0x147   :  { %v1347_v15 = vadd.f32 1e-05, %v1346_v38  ;;  %v1445_v38 = vld [vmem:[%s3003_s5 + $0x8] sm:$0xff] }
 0x149   :  { %2434 = vrsqrt.f32 %v1347_v15  ;;  %v2810_v15 = vand.u32 4294901760, %v1449_v32 }
 0x156   :  { %v2435_v28 = vpop.eup %2434 }
 0x157   :  { %v1349_v29 = vmul.f32 %v2435_v28, %v1325_v56  ;;  %v1350_v20 = vmul.f32 %v2435_v28, %v1326_v63  ;;  %v1351_v30 = vmul.f32 %v2435_v28, %v1327_v2  ;;  %v1352_v39 = vmul.f32 %v2435_v28, %v1328_v0 }
 0x159   :  { %v1373_v25 = vmul.f32 %v1356_v16, %v1349_v29  ;;  %v1374_v35 = vmul.f32 %v1361_v22, %v1350_v20  ;;  %v1375_v41 = vmul.f32 %v1366_v18, %v1351_v30  ;;  %v1376_v42 = vmul.f32 %v1371_v4, %v1352_v39  ;;  %v1446_v4 = vld [vmem:[%s3003_s5 + $0x10] sm:$0xff] }
 0x15a   :  { %v1452_v16 = vsel %vm1447_vm3, %v1445_v38, 0  ;;  %v2813_v22 = vsub.f32 %v1449_v32, %v2810_v15 }
 0x15b   :  { %v1397_v40 = vadd.f32 %v1380_v19, %v1373_v25  ;;  %v1398_v44 = vadd.f32 %v1385_v24, %v1374_v35  ;;  %v1399_v45 = vadd.f32 %v1390_v43, %v1375_v41  ;;  %v1400_v47 = vadd.f32 %v1395_v31, %v1376_v42 }
 0x15c   :  { %v2815_v18 = vand.u32 4294901760, %v1452_v16  ;;  %v1455_v19 = vsel %vm1447_vm3, %v1446_v4, 0  ;;  %v1528_v28 = vand.u32 4294901760, %v2813_v22 }
 0x15d   :  { %v1401_v5 = vsel %vm1309_vm1, %v1397_v40, -inf  ;;  %v1402_v48 = vsel %vm1309_vm1, %v1398_v44, -inf  ;;  %v1403_v49 = vsel %vm1309_vm1, %v1399_v45, -inf  ;;  %v1404_v50 = vsel %vm1309_vm1, %v1400_v47, -inf }
 0x15e   :  { %v1405_v9 = vmax.f32 %v1401_v5, %v1402_v48  ;;  %v1406_v51 = vmax.f32 %v1403_v49, %v1404_v50  ;;  %v2822_v29 = vsub.f32 %v1452_v16, %v2815_v18  ;;  %v2824_v35 = vand.u32 4294901760, %v1455_v19 }
 0x160   :  { %v1407_v10 = vmax.f32 %v1405_v9, %v1406_v51  ;;  %v1538_v5 = vand.u32 4294901760, %v2822_v29  ;;  %v2851_v49 = vsub.f32 %v1455_v19, %v2824_v35 }
 0x162   :  { %v1408_v54 = vrot.slane %v1407_v10, 4 }
 0x164   :  { %v1409_v17 = vmax.f32 %v1407_v10, %v1408_v54 }
 0x166   :  { %v1410_v53 = vrot.slane %v1409_v17, 2 }
 0x168   :  { %v1411_v11 = vmax.f32 %v1409_v17, %v1410_v53  ;;  %v1539_v53 = vsub.f32 %v2822_v29, %v1538_v5 }
 0x16a   :  { %v1412_v21 = vrot.slane %v1411_v11, 1 }
 0x16c   :  { %v1413_v55 = vmax.f32 %v1411_v11, %v1412_v21  ;;  %v1548_v21 = vand.u32 4294901760, %v2851_v49 }
 0x16e   :  { %v1414_v58 = vsub.f32 %v1397_v40, %v1413_v55  ;;  %v1415_v59 = vsub.f32 %v1398_v44, %v1413_v55  ;;  %v1416_v60 = vsub.f32 %v1399_v45, %v1413_v55  ;;  %v1417_v62 = vsub.f32 %v1400_v47, %v1413_v55 }
 0x16f   :  { %v1529_v40 = vsub.f32 %v2813_v22, %v1528_v28 }
 0x170   :  { %v1418_v52 = vmul.f32 1.442695, %v1414_v58  ;;  %v1420_v57 = vmul.f32 1.442695, %v1415_v59  ;;  %v1422_v56 = vmul.f32 1.442695, %v1416_v60 }
 0x171   :  { %v1424_v63 = vmul.f32 1.442695, %v1417_v62  ;;  %v1530_v51 = vand.u32 4294901760, %v1529_v40  ;;  %v1540_v60 = vand.u32 4294901760, %v1539_v53 }
 0x172   :  { %2436 = vpow2.f32 %v1418_v52  ;;  %v1549_v52 = vsub.f32 %v2851_v49, %v1548_v21 }
 0x173   :  { %2438 = vpow2.f32 %v1420_v57 }
 0x174   :  { %2440 = vpow2.f32 %v1422_v56 }
 0x175   :  { %2442 = vpow2.f32 %v1424_v63  ;;  %v1550_v63 = vand.u32 4294901760, %v1549_v52 }
 0x17f   :  { %v2437_v2 = vpop.eup %2436 }
 0x180   :  { %v2439_v0 = vpop.eup %2438  ;;  %v1426_v1 = vsel %vm1309_vm1, %v2437_v2, 0.0 }
 0x181   :  { %v2441_v3 = vpop.eup %2440  ;;  %v1427_v6 = vsel %vm1309_vm1, %v2439_v0, 0.0 }
 0x182   :  { %v2443_v8 = vpop.eup %2442  ;;  %v1428_v61 = vadd.f32 %v1427_v6, %v1426_v1  ;;  %v1429_v7 = vsel %vm1309_vm1, %v2441_v3, 0.0 }
 0x183   :  { %v1431_v23 = vsel %vm1309_vm1, %v2443_v8, 0.0 }
 0x184   :  { %v1430_v12 = vadd.f32 %v1429_v7, %v1428_v61 }
 0x186   :  { %v1432_v14 = vadd.f32 %v1431_v23, %v1430_v12 }
 0x188   :  { %v1433_v26 = vrot.slane %v1432_v14, 4 }
 0x18a   :  { %v1434_v13 = vadd.f32 %v1433_v26, %v1432_v14 }
 0x18c   :  { %v1435_v27 = vrot.slane %v1434_v13, 2 }
 0x18e   :  { %v1436_v33 = vadd.f32 %v1435_v27, %v1434_v13 }
 0x190   :  { %v1437_v34 = vrot.slane %v1436_v33, 1 }
 0x192   :  { %v1438_v36 = vadd.f32 %v1437_v34, %v1436_v33 }
 0x194   :  { %2444 = vrcp.f32 %v1438_v36 }
 0x1a1   :  { %v2445_v24 = vpop.eup %2444 }
 0x1a2   :  { %v1443_v20 = vmul.f32 %v2445_v24, %v2443_v8  ;;  %v1442_v30 = vmul.f32 %v2445_v24, %v2441_v3  ;;  %v1441_v39 = vmul.f32 %v2445_v24, %v2439_v0  ;;  %v1440_v25 = vmul.f32 %v2445_v24, %v2437_v2 }
 0x1a4   :  { %v2826_v41 = vand.u32 4294901760, %v1443_v20  ;;  %v2828_v42 = vand.u32 4294901760, %v1442_v30  ;;  %v2830_v43 = vand.u32 4294901760, %v1441_v39  ;;  %v2832_v31 = vand.u32 4294901760, %v1440_v25 }
 0x1a6   :  { %2327 = vmatpush3.msra.mxu0 %v2826_v41  ;;  %v1582_v44 = vsub.f32 %v1443_v20, %v2826_v41  ;;  %v2840_v45 = vsub.f32 %v1442_v30, %v2828_v42  ;;  %v2843_v47 = vsub.f32 %v1441_v39, %v2830_v43  ;;  %v2848_v48 = vsub.f32 %v1440_v25, %v2832_v31 }
 0x1a7   :  { %2328 = vmatprep.subr.mxu0 %v2455_v46 }
 0x1a8   :  { %2329 = vmatpush3.msra.mxu0 %v2828_v42  ;;  %v1583_v50 = vand.u32 4294901760, %v1582_v44  ;;  %v1590_v9 = vand.u32 4294901760, %v2840_v45  ;;  %v1597_v10 = vand.u32 4294901760, %v2843_v47  ;;  %v1604_v11 = vand.u32 4294901760, %v2848_v48 }
 0x1a9   :  { %2330 = vmatprep.subr.mxu0 %v2455_v46 }
 0x1aa   :  { %2331 = vmatpush3.msra.mxu0 %v2830_v43  ;;  %v1584_v54 = vsub.f32 %v1582_v44, %v1583_v50  ;;  %v1591_v17 = vsub.f32 %v2840_v45, %v1590_v9  ;;  %v1598_v58 = vsub.f32 %v2843_v47, %v1597_v10  ;;  %v1605_v62 = vsub.f32 %v2848_v48, %v1604_v11 }
 0x1ab   :  { %2332 = vmatprep.subr.mxu0 %v2455_v46 }
 0x1ac   :  { %2333 = vmatpush3.msra.mxu0 %v2832_v31  ;;  %v1585_v55 = vand.u32 4294901760, %v1584_v54  ;;  %v1592_v59 = vand.u32 4294901760, %v1591_v17  ;;  %v1599_v57 = vand.u32 4294901760, %v1598_v58  ;;  %v1606_v56 = vand.u32 4294901760, %v1605_v62 }
 0x1ad   :  { %2335 = vmatmul.mubr.f32.vlgmr.msra.gmra.mxu0 %v1530_v51  ;;  %2360 = vmatprep.subr.mxu0 %v2455_v46 }
 0x1ae   :  { %2344 = vmatpush3.msra.mxu1 %v1585_v55  ;;  %2361 = vmatpush3.msra.mxu0 %v1582_v44 }
 0x1af   :  { %2345 = vmatprep.subr.mxu1 %v2455_v46  ;;  %2362 = vmatprep.subr.mxu0 %v2455_v46 }
 0x1b0   :  { %2337 = vmatprep.mubr.msk.f32.mxu0 %vm2456_vm2, %v2455_v46  ;;  %2346 = vmatpush3.msra.mxu1 %v1592_v59 }
 0x1b1   :  { %2363 = vmatpush3.msra.mxu0 %v2840_v45  ;;  %2347 = vmatprep.subr.mxu1 %v2455_v46 }
 0x1b2   :  { %2338 = vmatmul.mubr.f32.gmra.mxu0 %v1540_v60  ;;  %2364 = vmatprep.subr.mxu0 %v2455_v46 }
 0x1b3   :  { %2348 = vmatpush3.msra.mxu1 %v1599_v57  ;;  %2365 = vmatpush3.msra.mxu0 %v2843_v47 }
 0x1b4   :  { %2349 = vmatprep.subr.mxu1 %v2455_v46  ;;  %2366 = vmatprep.subr.mxu0 %v2455_v46 }
 0x1b5   :  { %2340 = vmatprep.mubr.msk.f32.mxu0 %vm2456_vm2, %v2455_v46  ;;  %2350 = vmatpush3.msra.mxu1 %v1606_v56 }
 0x1b6   :  { %2367 = vmatpush3.msra.mxu0 %v2848_v48  ;;  %2352 = vmatmul.mubr.f32.vlgmr.msra.gmra.mxu1 %v2810_v15 }
 0x1b7   :  { %2341 = vmatmul.mubr.f32.gmra.mxu0 %v1550_v63  ;;  %2377 = vmatprep.subr.mxu1 %v2455_v46 }
 0x1b8   :  { %2378 = vmatpush3.msra.mxu1 %v2826_v41  ;;  %2354 = vmatprep.mubr.msk.f32.mxu1 %vm2456_vm2, %v2455_v46 }
 0x1b9   :  { %2379 = vmatprep.subr.mxu1 %v2455_v46  ;;  %2368 = vmatprep.mubr.msk.f32.mxu0 %vm2456_vm2, %v2455_v46 }
 0x1ba   :  { %2380 = vmatpush3.msra.mxu1 %v2828_v42  ;;  %2394 = vmatprep.subr.mxu0 %v2455_v46 }
 0x1bb   :  { %2355 = vmatmul.mubr.f32.gmra.mxu1 %v2815_v18  ;;  %2369 = vmatmul.mubr.f32.vlgmr.msra.gmra.mxu0 %v2813_v22 }
 0x1bc   :  { %2381 = vmatprep.subr.mxu1 %v2455_v46  ;;  %2395 = vmatpush3.msra.mxu0 %v1583_v50 }
 0x1bd   :  { %2382 = vmatpush3.msra.mxu1 %v2830_v43  ;;  %2396 = vmatprep.subr.mxu0 %v2455_v46 }
 0x1be   :  { %2383 = vmatprep.subr.mxu1 %v2455_v46  ;;  %2397 = vmatpush3.msra.mxu0 %v1590_v9 }
 0x1bf   :  { %2357 = vmatprep.mubr.msk.f32.mxu1 %vm2456_vm2, %v2455_v46  ;;  %2371 = vmatprep.mubr.msk.f32.mxu0 %vm2456_vm2, %v2455_v46 }
 0x1c0   :  { %2384 = vmatpush3.msra.mxu1 %v2832_v31  ;;  %2398 = vmatprep.subr.mxu0 %v2455_v46 }
 0x1c1   :  { %2358 = vmatmul.mubr.f32.gmra.mxu1 %v2824_v35  ;;  %2372 = vmatmul.mubr.f32.gmra.mxu0 %v2822_v29 }
 0x1c2   :  { %2399 = vmatpush3.msra.mxu0 %v1597_v10  ;;  %2374 = vmatprep.mubr.msk.f32.mxu0 %vm2456_vm2, %v2455_v46 }
 0x1c3   :  { %2400 = vmatprep.subr.mxu0 %v2455_v46  ;;  %2385 = vmatprep.mubr.msk.f32.mxu1 %vm2456_vm2, %v2455_v46 }
 0x1c4   :  { %2401 = vmatpush3.msra.mxu0 %v1604_v11  ;;  %2411 = vmatprep.subr.mxu1 %v2455_v46 }
 0x1c5   :  { %2375 = vmatmul.mubr.f32.gmra.mxu0 %v2851_v49  ;;  %2386 = vmatmul.mubr.f32.vlgmr.msra.gmra.mxu1 %v1528_v28 }
 0x1c6   :  { %2412 = vmatpush3.msra.mxu1 %v2826_v41  ;;  %2388 = vmatprep.mubr.msk.f32.mxu1 %vm2456_vm2, %v2455_v46 }
 0x1c7   :  { %2413 = vmatprep.subr.mxu1 %v2455_v46  ;;  %2402 = vmatprep.mubr.msk.f32.mxu0 %vm2456_vm2, %v2455_v46 }
 0x1c8   :  { %2414 = vmatpush3.msra.mxu1 %v2828_v42 }
 0x1c9   :  { %2415 = vmatprep.subr.mxu1 %v2455_v46  ;;  %2389 = vmatmul.mubr.f32.gmra.mxu1 %v1538_v5 }
 0x1ca   :  { %2403 = vmatmul.mubr.f32.vlgmr.msra.gmra.mxu0 %v2810_v15  ;;  %2416 = vmatpush3.msra.mxu1 %v2830_v43 }
 0x1cb   :  { %2417 = vmatprep.subr.mxu1 %v2455_v46  ;;  %2391 = vmatprep.mubr.msk.f32.mxu1 %vm2456_vm2, %v2455_v46 }
 0x1cc   :  { %2418 = vmatpush3.msra.mxu1 %v2832_v31  ;;  %2405 = vmatprep.mubr.msk.f32.mxu0 %vm2456_vm2, %v2455_v46 }
 0x1cd   :  { %2392 = vmatmul.mubr.f32.gmra.mxu1 %v1548_v21 }
 0x1ce   :  { %2406 = vmatmul.mubr.f32.gmra.mxu0 %v2815_v18  ;;  %2419 = vmatprep.mubr.msk.f32.mxu1 %vm2456_vm2, %v2455_v46 }
 0x1cf   :  { %2408 = vmatprep.mubr.msk.f32.mxu0 %vm2456_vm2, %v2455_v46 }
 0x1d1   :  { %2420 = vmatmul.mubr.f32.vlgmr.msra.gmra.mxu1 %v2810_v15 }
 0x1d2   :  { %2409 = vmatmul.mubr.f32.gmra.mxu0 %v2824_v35  ;;  %2422 = vmatprep.mubr.msk.f32.mxu1 %vm2456_vm2, %v2455_v46 }
 0x1d5   :  { %2423 = vmatmul.mubr.f32.gmra.mxu1 %v2815_v18 }
 0x1d6   :  { %2425 = vmatprep.mubr.msk.f32.mxu1 %vm2456_vm2, %v2455_v46 }
 0x1d9   :  { %2426 = vmatmul.mubr.f32.gmra.mxu1 %v2824_v35 }
 0x26d   :  { %v1532_v2 = vpop.f32.mrf.mxu0 }
 0x26f   :  { %v2336_v0 = vpop.f32.mrf.mxu0 }
 0x272   :  { %v1542_v1 = vpop.f32.mrf.mxu0 }
 0x274   :  { %v2339_v3 = vpop.f32.mrf.mxu0 }
 0x276   :  { %v1643_v6 = vpop.f32.mrf.mxu1 }
 0x277   :  { %v1552_v8 = vpop.f32.mrf.mxu0  ;;  %v1644_v4 = vadd.f32 %v1643_v6, %v1532_v2 }
 0x278   :  { %v2353_v61 = vpop.f32.mrf.mxu1 }
 0x279   :  { %v2342_v7 = vpop.f32.mrf.mxu0 }
 0x27b   :  { %v1649_v12 = vpop.f32.mrf.mxu1  ;;  %v1735_v23 = vpop.f32.mrf.mxu0 }
 0x27c   :  { %v1650_v19 = vadd.f32 %v1649_v12, %v1542_v1  ;;  %v1736_v29 = vadd.f32 %v1735_v23, %v1644_v4 }
 0x27d   :  { %v2356_v14 = vpop.f32.mrf.mxu1  ;;  %v2370_v26 = vpop.f32.mrf.mxu0 }
 0x281   :  { %v1655_v13 = vpop.f32.mrf.mxu1  ;;  %v1742_v27 = vpop.f32.mrf.mxu0 }
 0x282   :  { %v1743_v20 = vadd.f32 %v1742_v27, %v1650_v19  ;;  %v1656_v25 = vadd.f32 %v1655_v13, %v1552_v8 }
 0x283   :  { %v2359_v33 = vpop.f32.mrf.mxu1  ;;  %v2373_v34 = vpop.f32.mrf.mxu0 }
 0x285   :  { %v1749_v36 = vpop.f32.mrf.mxu0  ;;  %v1826_v46 = vpop.f32.mrf.mxu1 }
 0x286   :  { %v1827_v35 = vadd.f32 %v1826_v46, %v1736_v29  ;;  %v1750_v31 = vadd.f32 %v1749_v36, %v1656_v25 }
 0x287   :  { %v2376_v37 = vpop.f32.mrf.mxu0  ;;  %v2387_v32 = vpop.f32.mrf.mxu1 }
 0x288   :  { %v2073_v37 = vpop.permute.xlu0 %2072  ;;  %v2078_v32 = vpop.permute.xlu1 %2077 }
 0x289   :  { %v1834_v38 = vpop.f32.mrf.mxu1 }
 0x28a   :  { %v1925_v15 = vpop.f32.mrf.mxu0  ;;  %v1835_v41 = vadd.f32 %v1834_v38, %v1743_v20 }
 0x28b   :  { %v2390_v16 = vpop.f32.mrf.mxu1  ;;  %v1926_v40 = vadd.f32 %v1925_v15, %v1827_v35 }
 0x28c   :  { %v2404_v22 = vpop.f32.mrf.mxu0  ;;  %v2083_v38 = vpop.permute.xlu0 %2082 }
 0x28d   :  { %v1842_v18 = vpop.f32.mrf.mxu1  ;;  %v2091_v15 = vpop.permute.xlu1 %2090 }
 0x28e   :  { %v1931_v24 = vpop.f32.mrf.mxu0  ;;  %v1843_v5 = vadd.f32 %v1842_v18, %v1750_v31 }
 0x28f   :  { %v2393_v28 = vpop.f32.mrf.mxu1  ;;  %v1932_v44 = vadd.f32 %v1931_v24, %v1835_v41 }
 0x290   :  { %v2407_v30 = vpop.f32.mrf.mxu0  ;;  %v2096_v29 = vpop.permute.xlu0 %2095 }
 0x291   :  { %v2012_v39 = vpop.f32.mrf.mxu1  ;;  %v2101_v20 = vpop.permute.xlu1 %2100 }
 0x292   :  { %v1937_v42 = vpop.f32.mrf.mxu0  ;;  %v2013_v48 = vadd.f32 %v2012_v39, %v1926_v40 }
 0x293   :  { %v2421_v43 = vpop.f32.mrf.mxu1  ;;  %v1938_v9 = vadd.f32 %v1937_v42, %v1843_v5 }
 0x294   :  { %v2410_v45 = vpop.f32.mrf.mxu0  ;;  %v2034_v54 = vsel %vm1309_vm1, %v2013_v48, 0.0 }
 0x295   :  { %v2018_v47 = vpop.f32.mrf.mxu1 }
 0x296   :  { %v2019_v49 = vadd.f32 %v2018_v47, %v1932_v44 }
 0x297   :  { %v2424_v50 = vpop.f32.mrf.mxu1 }
 0x298   :  { %v2035_v51 = vsel %vm1309_vm1, %v2019_v49, 0.0 }
 0x299   :  { %v2024_v10 = vpop.f32.mrf.mxu1  ;;  %v2036_v53 = vadd.f32 %v2035_v51, %v2034_v54 }
 0x29a   :  { %v2025_v17 = vadd.f32 %v2024_v10, %v1938_v9 }
 0x29b   :  { %v2427_v11 = vpop.f32.mrf.mxu1 }
 0x29c   :  { %v2037_v21 = vsel %vm1309_vm1, %v2025_v17, 0.0 }
 0x29d   :  { %v2038_v55 = vadd.f32 %v2037_v21, %v2036_v53 }
 0x29f   :  { %v2039_v58 = vrot.slane %v2038_v55, 4 }
 0x2a1   :  { %v2040_v59 = vadd.f32 %v2039_v58, %v2038_v55 }
 0x2a3   :  { %v2041_v60 = vrot.slane %v2040_v59, 2 }
 0x2a5   :  { %v2042_v62 = vadd.f32 %v2041_v60, %v2040_v59 }
 0x2a7   :  { %v2043_v52 = vrot.slane %v2042_v62, 1 }
 0x2a9   :  { %v2044_v57 = vadd.f32 %v2043_v52, %v2042_v62 }
 0x2ab   :  { %v2046_v56 = vmul.f32 0.041666668, %v2044_v57 }
 0x2ad   :  { %v2047_v63 = vsub.f32 %v2013_v48, %v2046_v56  ;;  %v2048_v2 = vsub.f32 %v2019_v49, %v2046_v56  ;;  %v2049_v0 = vsub.f32 %v2025_v17, %v2046_v56 }
 0x2af   :  { %v2050_v1 = vmul.f32 %v2047_v63, %v2047_v63  ;;  %v2051_v3 = vmul.f32 %v2048_v2, %v2048_v2  ;;  %v2052_v6 = vmul.f32 %v2049_v0, %v2049_v0 }
 0x2b1   :  { %v2053_v8 = vsel %vm1309_vm1, %v2050_v1, 0.0  ;;  %v2054_v61 = vsel %vm1309_vm1, %v2051_v3, 0.0  ;;  %v2056_v12 = vsel %vm1309_vm1, %v2052_v6, 0.0 }
 0x2b2   :  { %v2055_v7 = vadd.f32 %v2054_v61, %v2053_v8 }
 0x2b4   :  { %v2057_v23 = vadd.f32 %v2056_v12, %v2055_v7 }
 0x2b6   :  { %v2058_v14 = vrot.slane %v2057_v23, 4 }
 0x2b8   :  { %v2059_v26 = vadd.f32 %v2058_v14, %v2057_v23 }
 0x2ba   :  { %v2060_v13 = vrot.slane %v2059_v26, 2 }
 0x2bc   :  { %v2061_v27 = vadd.f32 %v2060_v13, %v2059_v26 }
 0x2be   :  { %v2062_v33 = vrot.slane %v2061_v27, 1 }
 0x2c0   :  { %v2063_v34 = vadd.f32 %v2062_v33, %v2061_v27 }
 0x2c2   :  { %v2064_v36 = vmul.f32 0.041666668, %v2063_v34 }
 0x2c4   :  { %v2065_v46 = vadd.f32 1e-05, %v2064_v36 }
 0x2c6   :  { %2446 = vrsqrt.f32 %v2065_v46 }
 0x2d3   :  { %v2447_v16 = vpop.eup %2446 }
 0x2d4   :  { %v2067_v22 = vmul.f32 %v2447_v16, %v2047_v63  ;;  %v2068_v18 = vmul.f32 %v2447_v16, %v2048_v2  ;;  %v2069_v4 = vmul.f32 %v2447_v16, %v2049_v0 }
 0x2d6   :  { %v2085_v19 = vmul.f32 %v2073_v37, %v2067_v22  ;;  %v2086_v24 = vmul.f32 %v2078_v32, %v2068_v18  ;;  %v2087_v28 = vmul.f32 %v2083_v38, %v2069_v4 }
 0x2d8   :  { %v2957_v30 = vadd.f32 %v2091_v15, %v2085_v19  ;;  %v2959_v39 = vadd.f32 %v2096_v29, %v2086_v24  ;;  %v2961_v25 = vadd.f32 %v2101_v20, %v2087_v28 }
 0x2da   :  { %v2109_v35 = vmul.f32 0.70710677, %v2957_v30  ;;  %v2110_v41 = vmul.f32 0.70710677, %v2959_v39  ;;  %v2111_v42 = vmul.f32 0.70710677, %v2961_v25 }
 0x2dc   :  { %v2966_v43 = vclamps-f32 %v2109_v35, 4.0  ;;  %v2968_v31 = vclamps-f32 %v2110_v41, 4.0  ;;  %v2970_v40 = vclamps-f32 %v2111_v42, 4.0 }
 0x2de   :  { %v2118_v44 = vmul.f32 %v2966_v43, %v2966_v43  ;;  %v2119_v45 = vmul.f32 %v2968_v31, %v2968_v31  ;;  %v2120_v47 = vmul.f32 %v2970_v40, %v2970_v40 }
 0x2e0   :  { %v2121_v5 = vmul.f32 -2.7261424e-10, %v2118_v44  ;;  %v2157_v48 = vmul.f32 -1.45660715e-05, %v2118_v44  ;;  %v2122_v49 = vmul.f32 -2.7261424e-10, %v2119_v45 }
 0x2e1   :  { %v2123_v50 = vmul.f32 -2.7261424e-10, %v2120_v47  ;;  %v2158_v9 = vmul.f32 -1.45660715e-05, %v2119_v45  ;;  %v2159_v10 = vmul.f32 -1.45660715e-05, %v2120_v47 }
 0x2e2   :  { %v2124_v51 = vadd.f32 2.7706815e-08, %v2121_v5  ;;  %v2160_v54 = vadd.f32 -0.00021337405, %v2157_v48  ;;  %v2125_v17 = vadd.f32 2.7706815e-08, %v2122_v49 }
 0x2e3   :  { %v2126_v53 = vadd.f32 2.7706815e-08, %v2123_v50  ;;  %v2161_v11 = vadd.f32 -0.00021337405, %v2158_v9  ;;  %v2162_v55 = vadd.f32 -0.00021337405, %v2159_v10 }
 0x2e4   :  { %v2127_v21 = vmul.f32 %v2124_v51, %v2118_v44  ;;  %v2163_v58 = vmul.f32 %v2160_v54, %v2118_v44  ;;  %v2128_v59 = vmul.f32 %v2125_v17, %v2119_v45 }
 0x2e5   :  { %v2129_v60 = vmul.f32 %v2126_v53, %v2120_v47  ;;  %v2164_v62 = vmul.f32 %v2161_v11, %v2119_v45  ;;  %v2165_v57 = vmul.f32 %v2162_v55, %v2120_v47 }
 0x2e6   :  { %v2130_v52 = vadd.f32 -2.101024e-06, %v2127_v21  ;;  %v2166_v56 = vadd.f32 -0.001682827, %v2163_v58  ;;  %v2131_v63 = vadd.f32 -2.101024e-06, %v2128_v59 }
 0x2e7   :  { %v2132_v2 = vadd.f32 -2.101024e-06, %v2129_v60  ;;  %v2167_v0 = vadd.f32 -0.001682827, %v2164_v62  ;;  %v2168_v3 = vadd.f32 -0.001682827, %v2165_v57 }
 0x2e8   :  { %v2133_v1 = vmul.f32 %v2130_v52, %v2118_v44  ;;  %v2169_v6 = vmul.f32 %v2166_v56, %v2118_v44  ;;  %v2134_v8 = vmul.f32 %v2131_v63, %v2119_v45  ;;  %v2106_v58 = vmul.f32 0.5, %v2957_v30 }
 0x2e9   :  { %v2135_v61 = vmul.f32 %v2132_v2, %v2120_v47  ;;  %v2170_v7 = vmul.f32 %v2167_v0, %v2119_v45  ;;  %v2171_v23 = vmul.f32 %v2168_v3, %v2120_v47  ;;  %v2108_v60 = vmul.f32 0.5, %v2961_v25 }
 0x2ea   :  { %v2136_v12 = vadd.f32 -5.6925062e-05, %v2133_v1  ;;  %v2172_v14 = vadd.f32 -0.0073733293, %v2169_v6  ;;  %v2137_v26 = vadd.f32 -5.6925062e-05, %v2134_v8 }
 0x2eb   :  { %v2138_v13 = vadd.f32 -5.6925062e-05, %v2135_v61  ;;  %v2173_v27 = vadd.f32 -0.0073733293, %v2170_v7  ;;  %v2174_v34 = vadd.f32 -0.0073733293, %v2171_v23 }
 0x2ec   :  { %v2139_v33 = vmul.f32 %v2136_v12, %v2118_v44  ;;  %v2175_v36 = vmul.f32 %v2172_v14, %v2118_v44  ;;  %v2140_v46 = vmul.f32 %v2137_v26, %v2119_v45 }
 0x2ed   :  { %v2141_v37 = vmul.f32 %v2138_v13, %v2120_v47  ;;  %v2176_v32 = vmul.f32 %v2173_v27, %v2119_v45  ;;  %v2177_v15 = vmul.f32 %v2174_v34, %v2120_v47 }
 0x2ee   :  { %v2142_v38 = vadd.f32 -0.00073499064, %v2139_v33  ;;  %v2178_v16 = vadd.f32 -0.014264739, %v2175_v36  ;;  %v2143_v22 = vadd.f32 -0.00073499064, %v2140_v46 }
 0x2ef   :  { %v2144_v18 = vadd.f32 -0.00073499064, %v2141_v37  ;;  %v2179_v4 = vadd.f32 -0.014264739, %v2176_v32  ;;  %v2180_v24 = vadd.f32 -0.014264739, %v2177_v15 }
 0x2f0   :  { %v2145_v19 = vmul.f32 %v2142_v38, %v2118_v44  ;;  %2448 = vrcp.f32 %v2178_v16  ;;  %v2146_v28 = vmul.f32 %v2143_v22, %v2119_v45 }
 0x2f1   :  { %v2147_v29 = vmul.f32 %v2144_v18, %v2120_v47  ;;  %2450 = vrcp.f32 %v2179_v4 }
 0x2f2   :  { %v2148_v20 = vadd.f32 -0.0029546, %v2145_v19  ;;  %2452 = vrcp.f32 %v2180_v24  ;;  %v2149_v35 = vadd.f32 -0.0029546, %v2146_v28 }
 0x2f3   :  { %v2150_v41 = vadd.f32 -0.0029546, %v2147_v29 }
 0x2f4   :  { %v2151_v42 = vmul.f32 %v2148_v20, %v2118_v44  ;;  %v2152_v5 = vmul.f32 %v2149_v35, %v2119_v45  ;;  %v2107_v45 = vmul.f32 0.5, %v2959_v39 }
 0x2f5   :  { %v2153_v48 = vmul.f32 %v2150_v41, %v2120_v47 }
 0x2f6   :  { %v2154_v49 = vadd.f32 -0.016096033, %v2151_v42  ;;  %v2155_v50 = vadd.f32 -0.016096033, %v2152_v5 }
 0x2f7   :  { %v2156_v9 = vadd.f32 -0.016096033, %v2153_v48 }
 0x2f8   :  { %v2181_v51 = vmul.f32 %v2966_v43, %v2154_v49  ;;  %v2182_v54 = vmul.f32 %v2968_v31, %v2155_v50 }
 0x2f9   :  { %v2183_v53 = vmul.f32 %v2970_v40, %v2156_v9 }
 0x2fd   :  { %v2449_v10 = vpop.eup %2448 }
 0x2fe   :  { %v2451_v17 = vpop.eup %2450  ;;  %v2187_v11 = vmul.f32 %v2449_v10, %v2181_v51 }
 0x2ff   :  { %v2453_v21 = vpop.eup %2452  ;;  %v2188_v55 = vmul.f32 %v2451_v17, %v2182_v54 }
 0x300   :  { %v2189_v59 = vmul.f32 %v2453_v21, %v2183_v53  ;;  %v2190_v44 = vadd.f32 1.0, %v2187_v11 }
 0x301   :  { %v2191_v47 = vadd.f32 1.0, %v2188_v55 }
 0x302   :  { %v2192_v62 = vadd.f32 1.0, %v2189_v59  ;;  %v2193_v43 = vmul.f32 %v2190_v44, %v2106_v58 }
 0x303   :  { %v2194_v52 = vmul.f32 %v2191_v47, %v2107_v45 }
 0x304   :  { %v2195_v57 = vmul.f32 %v2192_v62, %v2108_v60  ;;  %2196 = vst.msk [vmem:[%s3004_s8] sm:$0xff] %vm1309_vm1, %v2193_v43 }
 0x305   :  { %2197 = vst.msk [vmem:[%s3004_s8 + $0x8] sm:$0xff] %vm1309_vm1, %v2194_v52 }
 0x306   :  { %2198 = vst.msk [vmem:[%s3004_s8 + $0x10] sm:$0xff] %vm1309_vm1, %v2195_v57 }

</bundles_post_ra>
